<compile_context>
chip_gen: v6e
topology: v6e:2x2x1
jax: 0.10.0
libtpu: 0.0.40
codegen_flags: <defaults>
</compile_context>

<pallas_src>
import functools

import jax
import jax.numpy as jnp
from jax.experimental import pallas as pl
from jax.experimental.pallas import tpu as pltpu

_LANE = 128


def _round_up(x, m):
    return (x + m - 1) // m * m


# ----------------------------------------------------------------------------
# Fused kernel: stem conv3x3 (as one im2col matmul) + ReLU + conv_head 1x1 +
# ReLU + streaming GAP + (at t == last) classifier + optional activation.
#
# grid = (B, n_row_tiles).  The whole padded image of batch element b is the
# resident input block (index_map ignores t); each t processes rows
# [t*tile_h, (t+1)*tile_h) and accumulates channel sums into a (1, Chead_p)
# VMEM scratch.  The last t applies 1/(H*W), the classifier matmul and the
# (masked) softmax / sigmoid, writing (1, ncls_p) per batch element.
# ----------------------------------------------------------------------------
def _fused_backbone_kernel(x_ref, ws_ref, bs_ref, wh_ref, bh_ref, wc_ref,
                           bc_ref, out_ref, patch_ref, gap_ref, *,
                           tile_h, out_w, c_in, real_h, inv_hw, mask_rows,
                           num_classes, activate):
    t = pl.program_id(1)
    m = tile_h * out_w

    @pl.when(t == 0)
    def _init():
        # Zero the GAP accumulator and the K-padding tail of the im2col
        # scratch (taps overwrite lanes [0, 9*C) every step, tail stays 0).
        gap_ref[...] = jnp.zeros(gap_ref.shape, gap_ref.dtype)
        patch_ref[...] = jnp.zeros(patch_ref.shape, patch_ref.dtype)

    # ---- in-VMEM im2col of one (tile_h, W) row tile -------------------------
    # Only the (tile_h+2)-row halo window of the resident image is read.
    r0 = pl.multiple_of(t * tile_h, tile_h)
    win = x_ref[pl.ds(r0, tile_h + 2)].astype(jnp.float32)  # (tile_h+2, W+2, C)
    for dh in range(3):
        for dw in range(3):
            piece = win[dh:dh + tile_h, dw:dw + out_w, :].reshape(m, c_in)
            off = (dh * 3 + dw) * c_in
            patch_ref[:, off:off + c_in] = piece

    patch = patch_ref[...].astype(jnp.bfloat16)              # (m, k_pad)

    # ---- stem conv3x3 as a single MXU matmul + bias + ReLU ------------------
    acc = jnp.dot(patch, ws_ref[...], preferred_element_type=jnp.float32)
    stem = jnp.maximum(acc + bs_ref[...], 0.0).astype(jnp.bfloat16)

    # ---- conv_head 1x1 + bias + ReLU (feature map never leaves VMEM) --------
    feat = jnp.dot(stem, wh_ref[...], preferred_element_type=jnp.float32)
    feat = jnp.maximum(feat + bh_ref[...], 0.0)               # (m, Chead_p) f32

    # ---- streaming global-average-pool accumulation -------------------------
    if mask_rows:  # ragged bottom tile: drop rows >= real H from the sum
        row = jax.lax.broadcasted_iota(jnp.int32, feat.shape, 0)
        feat = jnp.where(r0 + row // out_w < real_h, feat, 0.0)
    gap_ref[...] = gap_ref[...] + jnp.sum(feat, axis=0, keepdims=True)

    # ---- finalize: GAP mean -> fused classifier -> optional activation ------
    @pl.when(t == pl.num_programs(1) - 1)
    def _finalize():
        pooled = (gap_ref[...] * inv_hw).astype(jnp.bfloat16)     # (1, Chead_p)
        pooled = jnp.broadcast_to(pooled, (8, pooled.shape[1]))
        logits = jnp.dot(pooled, wc_ref[...],
                         preferred_element_type=jnp.float32) + bc_ref[...]
        if activate:
            if num_classes > 1:
                col = jax.lax.broadcasted_iota(jnp.int32, logits.shape, 1)
                valid = col < num_classes          # mask padded class lanes
                z = jnp.where(valid, logits, jnp.finfo(jnp.float32).min)
                z = z - jnp.max(z, axis=1, keepdims=True)
                e = jnp.where(valid, jnp.exp(z), 0.0)
                logits = e / jnp.sum(e, axis=1, keepdims=True)
            else:
                logits = 1.0 / (1.0 + jnp.exp(-logits))
        out_ref[...] = logits[0:1].astype(out_ref.dtype)


# ----------------------------------------------------------------------------
# tile_h from a per-step VMEM budget (generation-aware: a few MiB per step
# leaves ample headroom even on v7x's 64 MiB physical VMEM).
# ----------------------------------------------------------------------------
def _pick_tile_h(h, w, k_pad, cstem_p, chead_p, tile_h_max=None):
    # live intermediates per output row: im2col patch (f32 scratch + bf16 copy)
    # + conv accumulator/stem + head features.
    per_row = w * (k_pad * (4 + 2) + cstem_p * (4 + 2) + chead_p * 4)
    budget = 8 * 2 ** 20
    tile_h = int(min(h, max(1, budget // per_row)))
    if tile_h < h and tile_h >= 8:
        tile_h = tile_h // 8 * 8          # clean sublane multiples when tiling
    if tile_h_max is not None:
        tile_h = max(1, min(tile_h, int(tile_h_max)))
    return min(tile_h, h)


# ----------------------------------------------------------------------------
# Parameters (w_stem flattened in (kh, kw, Cin) order, matching the im2col K).
# ----------------------------------------------------------------------------
def init_params(key, c_in, c_stem, c_head, num_classes):
    k1, k2, k3, k4, k5, k6 = jax.random.split(key, 6)
    return {
        "w_stem": 0.1 * jax.random.normal(k1, (9 * c_in, c_stem), jnp.float32),
        "b_stem": 0.1 * jax.random.normal(k2, (c_stem,), jnp.float32),
        "w_head": 0.1 * jax.random.normal(k3, (c_stem, c_head), jnp.float32),
        "b_head": 0.1 * jax.random.normal(k4, (c_head,), jnp.float32),
        "w_cls": 0.1 * jax.random.normal(k5, (c_head, num_classes), jnp.float32),
        "b_cls": 0.1 * jax.random.normal(k6, (num_classes,), jnp.float32),
    }


# ----------------------------------------------------------------------------
# Forward pass (mirrors TimmModel.forward(x, activate)).
# ----------------------------------------------------------------------------
def timm_model_forward(x_nchw, params, *, num_classes, activate=False,
                       tile_h_max=None):
    B, C, H, W = x_nchw.shape
    c_stem = params["w_stem"].shape[1]
    c_head = params["w_head"].shape[1]

    k_real = 9 * C
    k_pad = _round_up(k_real, _LANE)
    cstem_p = _round_up(c_stem, _LANE)
    chead_p = _round_up(c_head, _LANE)
    ncls_p = _round_up(num_classes, _LANE)

    tile_h = _pick_tile_h(H, W, k_pad, cstem_p, chead_p, tile_h_max)
    n_tiles = -(-H // tile_h)
    h_pad = n_tiles * tile_h
    m = tile_h * W

    # -- input prep: one fused NCHW->NHWC transpose + bf16 cast + halo /
    #    ragged-bottom zero pad.  Real channel count stays as the last dim
    #    (no 128-lane HBM inflation, no overlapping-tile stack).
    x = jnp.transpose(x_nchw, (0, 2, 3, 1)).astype(jnp.bfloat16)
    x = jnp.pad(x, ((0, 0), (1, 1 + h_pad - H), (1, 1), (0, 0)))

    # -- weight prep (tiny; pad K / output channels, bf16 matmul operands) ----
    w_stem = jnp.pad(params["w_stem"], ((0, k_pad - k_real),
                                        (0, cstem_p - c_stem))).astype(jnp.bfloat16)
    b_stem = jnp.pad(params["b_stem"], (0, cstem_p - c_stem)
                     ).reshape(1, cstem_p).astype(jnp.float32)
    w_head = jnp.pad(params["w_head"], ((0, cstem_p - c_stem),
                                        (0, chead_p - c_head))).astype(jnp.bfloat16)
    b_head = jnp.pad(params["b_head"], (0, chead_p - c_head)
                     ).reshape(1, chead_p).astype(jnp.float32)
    w_cls = jnp.pad(params["w_cls"], ((0, chead_p - c_head),
                                      (0, ncls_p - num_classes))).astype(jnp.bfloat16)
    b_cls = jnp.pad(params["b_cls"], (0, ncls_p - num_classes)
                    ).reshape(1, ncls_p).astype(jnp.float32)

    # -- rough VMEM estimate (resident image x2 buffers + weights + scratch +
    #    per-step intermediates) -> explicit limit, capped v7x-safe.
    in_block = (h_pad + 2) * _round_up(W + 2, 16) * _LANE * 2
    weights = 2 * (k_pad * cstem_p + cstem_p * chead_p + chead_p * ncls_p) * 2
    scratch = m * k_pad * 4 + 8 * chead_p * 4
    interm = m * (k_pad * 6 + cstem_p * 6 + chead_p * 8)
    est = 2 * in_block + weights + scratch + interm + 2 * 8 * ncls_p * 4
    vmem_limit = int(min(max(2 * est, 32 * 2 ** 20), 60 * 2 ** 20))

    kernel = functools.partial(
        _fused_backbone_kernel, tile_h=tile_h, out_w=W, c_in=C, real_h=H,
        inv_hw=1.0 / (H * W), mask_rows=(h_pad != H),
        num_classes=num_classes, activate=activate)

    # TODO(synk): v7x-only suggestion (split the row-tile axis across the two
    # TensorCores when B is small) is not implemented; batch axis is parallel.
    out = pl.pallas_call(
        kernel,
        out_shape=jax.ShapeDtypeStruct((B, 1, ncls_p), jnp.float32),
        grid=(B, n_tiles),
        in_specs=[
            # whole padded image of one batch element, resident across the
            # row-tile axis (index_map ignores t -> DMA'd once per image).
            pl.BlockSpec((None, h_pad + 2, W + 2, C), lambda b, t: (b, 0, 0, 0)),
            pl.BlockSpec((k_pad, cstem_p), lambda b, t: (0, 0)),
            pl.BlockSpec((1, cstem_p), lambda b, t: (0, 0)),
            pl.BlockSpec((cstem_p, chead_p), lambda b, t: (0, 0)),
            pl.BlockSpec((1, chead_p), lambda b, t: (0, 0)),
            pl.BlockSpec((chead_p, ncls_p), lambda b, t: (0, 0)),
            pl.BlockSpec((1, ncls_p), lambda b, t: (0, 0)),
        ],
        out_specs=pl.BlockSpec((None, 1, ncls_p), lambda b, t: (b, 0, 0)),
        scratch_shapes=[
            pltpu.VMEM((m, k_pad), jnp.float32),      # im2col patch matrix
            pltpu.VMEM((1, chead_p), jnp.float32),    # streaming GAP accumulator
        ],
        compiler_params=pltpu.CompilerParams(
            dimension_semantics=("parallel", "arbitrary"),
            vmem_limit_bytes=vmem_limit),
    )(x, w_stem, b_stem, w_head, b_head, w_cls, b_cls)

    return out[:, 0, :num_classes]


# ----------------------------------------------------------------------------
# Pure-JAX reference (same bf16 operand / f32 accumulation path) for checking.
# ----------------------------------------------------------------------------
def _reference_forward(x_nchw, params, num_classes, activate):
    B, C, H, W = x_nchw.shape
    c_stem = params["w_stem"].shape[1]
    x = jnp.transpose(x_nchw, (0, 2, 3, 1)).astype(jnp.bfloat16)
    xp = jnp.pad(x, ((0, 0), (1, 1), (1, 1), (0, 0)))
    w = params["w_stem"].reshape(3, 3, C, c_stem).astype(jnp.bfloat16)
    acc = jnp.zeros((B, H, W, c_stem), jnp.float32)
    for dh in range(3):
        for dw in range(3):
            acc = acc + jax.lax.dot_general(
                xp[:, dh:dh + H, dw:dw + W, :], w[dh, dw],
                (((3,), (0,)), ((), ())), preferred_element_type=jnp.float32)
    stem = jnp.maximum(acc + params["b_stem"], 0.0).astype(jnp.bfloat16)
    feat = jax.lax.dot_general(stem, params["w_head"].astype(jnp.bfloat16),
                               (((3,), (0,)), ((), ())),
                               preferred_element_type=jnp.float32)
    feat = jnp.maximum(feat + params["b_head"], 0.0)
    pooled = jnp.mean(feat, axis=(1, 2))
    logits = pooled @ params["w_cls"] + params["b_cls"]
    if activate:
        logits = (jax.nn.softmax(logits, axis=1) if num_classes > 1
                  else jax.nn.sigmoid(logits))
    return logits


if __name__ == "__main__":
    key = jax.random.PRNGKey(0)
    k_in, k_p, k_in2 = jax.random.split(key, 3)

    B, C, H, W = 2, 4, 16, 16
    NUM_CLASSES = 10
    C_STEM, C_HEAD = 32, 64

    x = jax.random.normal(k_in, (B, C, H, W), jnp.float32)      # NCHW input
    params = init_params(k_p, C, C_STEM, C_HEAD, NUM_CLASSES)

    fwd = jax.jit(functools.partial(timm_model_forward,
                                    num_classes=NUM_CLASSES, activate=False))
    fwd_act = jax.jit(functools.partial(timm_model_forward,
                                        num_classes=NUM_CLASSES, activate=True))

    logits = fwd(x, params)
    probs = fwd_act(x, params)
    jax.block_until_ready((logits, probs))

    assert logits.shape == (B, NUM_CLASSES)
    assert probs.shape == (B, NUM_CLASSES)
    # softmax rows must sum to 1
    assert jnp.allclose(jnp.sum(probs, axis=1), 1.0, atol=1e-5)

    # numeric check against the pure-JAX reference
    ref_logits = _reference_forward(x, params, NUM_CLASSES, False)
    ref_probs = _reference_forward(x, params, NUM_CLASSES, True)
    assert jnp.allclose(logits, ref_logits, atol=2e-2, rtol=2e-2)
    assert jnp.allclose(probs, ref_probs, atol=2e-2, rtol=2e-2)

    # ragged-H / multi-row-tile path: streaming GAP + in-kernel row masking
    H2, W2 = 13, 16
    x2 = jax.random.normal(k_in2, (B, C, H2, W2), jnp.float32)
    fwd_ragged = jax.jit(functools.partial(timm_model_forward,
                                           num_classes=NUM_CLASSES,
                                           activate=False, tile_h_max=6))
    out2 = fwd_ragged(x2, params)
    jax.block_until_ready(out2)
    ref2 = _reference_forward(x2, params, NUM_CLASSES, False)
    assert out2.shape == (B, NUM_CLASSES)
    assert jnp.allclose(out2, ref2, atol=2e-2, rtol=2e-2)

    print("KERNEL_OK")
</pallas_src>

<mosaic_0001>
module attributes {stable_mosaic.version = 11 : i64} {
  func.func @_fused_backbone_kernel(%arg0: i32, %arg1: i32, %arg2: memref<1x18x18x4xbf16, #tpu.memory_space<vmem>>, %arg3: memref<128x128xbf16, #tpu.memory_space<vmem>>, %arg4: memref<1x128xf32, #tpu.memory_space<vmem>>, %arg5: memref<128x128xbf16, #tpu.memory_space<vmem>>, %arg6: memref<1x128xf32, #tpu.memory_space<vmem>>, %arg7: memref<128x128xbf16, #tpu.memory_space<vmem>>, %arg8: memref<1x128xf32, #tpu.memory_space<vmem>>, %arg9: memref<1x1x128xf32, #tpu.memory_space<vmem>>, %arg10: memref<256x128xf32, #tpu.memory_space<vmem>>, %arg11: memref<1x128xf32, #tpu.memory_space<vmem>>) attributes {dimension_semantics = [#tpu.dimension_semantics<parallel>, #tpu.dimension_semantics<arbitrary>], iteration_bounds = array<i64: 2, 1>, scalar_prefetch = 0 : i64, scratch_operands = 2 : i64, tpu.core_type = #tpu.core_type<tc>, window_params = [{transform_indices = @transform_0, window_bounds = array<i64: 1, 18, 18, 4>}, {pipeline_mode = #tpu.pipeline_mode<synchronous>, transform_indices = @transform_1, window_bounds = array<i64: 128, 128>}, {pipeline_mode = #tpu.pipeline_mode<synchronous>, transform_indices = @transform_2, window_bounds = array<i64: 1, 128>}, {pipeline_mode = #tpu.pipeline_mode<synchronous>, transform_indices = @transform_3, window_bounds = array<i64: 128, 128>}, {pipeline_mode = #tpu.pipeline_mode<synchronous>, transform_indices = @transform_4, window_bounds = array<i64: 1, 128>}, {pipeline_mode = #tpu.pipeline_mode<synchronous>, transform_indices = @transform_5, window_bounds = array<i64: 128, 128>}, {pipeline_mode = #tpu.pipeline_mode<synchronous>, transform_indices = @transform_6, window_bounds = array<i64: 1, 128>}, {transform_indices = @transform_7, window_bounds = array<i64: 1, 1, 128>}]} {
    %c0_i32 = arith.constant 0 : i32
    %0 = arith.cmpi eq, %arg1, %c0_i32 : i32
    %1 = arith.extui %0 : i1 to i32
    %c0_i32_0 = arith.constant 0 : i32
    %2 = arith.cmpi ne, %1, %c0_i32_0 : i32
    scf.if %2 {
      %cst_33 = arith.constant 0.000000e+00 : f32
      %61 = vector.broadcast %cst_33 : f32 to vector<1x128xf32>
      %c0_34 = arith.constant 0 : index
      %c0_35 = arith.constant 0 : index
      %62 = vector.load %arg11[%c0_34, %c0_35] : memref<1x128xf32, #tpu.memory_space<vmem>>, vector<1x128xf32>
      tpu.vector_store %arg11[%c0_34, %c0_35], %61 {strides = array<i32>} : memref<1x128xf32, #tpu.memory_space<vmem>>, vector<1x128xf32>,
      %cst_36 = arith.constant 0.000000e+00 : f32
      %63 = vector.broadcast %cst_36 : f32 to vector<256x128xf32>
      %c0_37 = arith.constant 0 : index
      %c0_38 = arith.constant 0 : index
      %64 = vector.load %arg10[%c0_37, %c0_38] : memref<256x128xf32, #tpu.memory_space<vmem>>, vector<256x128xf32>
      tpu.vector_store %arg10[%c0_37, %c0_38], %63 {strides = array<i32>} : memref<256x128xf32, #tpu.memory_space<vmem>>, vector<256x128xf32>,
    } else {
    }
    %c16_i32 = arith.constant 16 : i32
    %3 = arith.muli %arg1, %c16_i32 : i32
    %4 = tpu.assume_multiple %3, 16 : i32
    %c0 = arith.constant 0 : index
    %5 = arith.index_cast %4 : i32 to index
    %c0_1 = arith.constant 0 : index
    %c0_2 = arith.constant 0 : index
    %6 = vector.load %arg2[%c0, %5, %c0_1, %c0_2] : memref<1x18x18x4xbf16, #tpu.memory_space<vmem>>, vector<1x18x18x4xbf16>
    %7 = vector.shape_cast %6 : vector<1x18x18x4xbf16> to vector<18x18x4xbf16>
    %8 = arith.extf %7 : vector<18x18x4xbf16> to vector<18x18x4xf32>
    %9 = vector.extract_strided_slice %8 {offsets = [0, 0, 0], sizes = [16, 16, 4], strides = [1, 1, 1]} : vector<18x18x4xf32> to vector<16x16x4xf32>
    %10 = vector.shape_cast %9 : vector<16x16x4xf32> to vector<256x4xf32>
    %c0_3 = arith.constant 0 : index
    %c0_4 = arith.constant 0 : index
    %11 = vector.load %arg10[%c0_3, %c0_4] : memref<256x128xf32, #tpu.memory_space<vmem>>, vector<256x4xf32>
    tpu.vector_store %arg10[%c0_3, %c0_4], %10 {strides = array<i32>} : memref<256x128xf32, #tpu.memory_space<vmem>>, vector<256x4xf32>,
    %12 = vector.extract_strided_slice %8 {offsets = [0, 1, 0], sizes = [16, 16, 4], strides = [1, 1, 1]} : vector<18x18x4xf32> to vector<16x16x4xf32>
    %13 = vector.shape_cast %12 : vector<16x16x4xf32> to vector<256x4xf32>
    %c0_5 = arith.constant 0 : index
    %c4 = arith.constant 4 : index
    %14 = vector.load %arg10[%c0_5, %c4] : memref<256x128xf32, #tpu.memory_space<vmem>>, vector<256x4xf32>
    tpu.vector_store %arg10[%c0_5, %c4], %13 {strides = array<i32>} : memref<256x128xf32, #tpu.memory_space<vmem>>, vector<256x4xf32>,
    %15 = vector.extract_strided_slice %8 {offsets = [0, 2, 0], sizes = [16, 16, 4], strides = [1, 1, 1]} : vector<18x18x4xf32> to vector<16x16x4xf32>
    %16 = vector.shape_cast %15 : vector<16x16x4xf32> to vector<256x4xf32>
    %c0_6 = arith.constant 0 : index
    %c8 = arith.constant 8 : index
    %17 = vector.load %arg10[%c0_6, %c8] : memref<256x128xf32, #tpu.memory_space<vmem>>, vector<256x4xf32>
    tpu.vector_store %arg10[%c0_6, %c8], %16 {strides = array<i32>} : memref<256x128xf32, #tpu.memory_space<vmem>>, vector<256x4xf32>,
    %18 = vector.extract_strided_slice %8 {offsets = [1, 0, 0], sizes = [16, 16, 4], strides = [1, 1, 1]} : vector<18x18x4xf32> to vector<16x16x4xf32>
    %19 = vector.shape_cast %18 : vector<16x16x4xf32> to vector<256x4xf32>
    %c0_7 = arith.constant 0 : index
    %c12 = arith.constant 12 : index
    %20 = vector.load %arg10[%c0_7, %c12] : memref<256x128xf32, #tpu.memory_space<vmem>>, vector<256x4xf32>
    tpu.vector_store %arg10[%c0_7, %c12], %19 {strides = array<i32>} : memref<256x128xf32, #tpu.memory_space<vmem>>, vector<256x4xf32>,
    %21 = vector.extract_strided_slice %8 {offsets = [1, 1, 0], sizes = [16, 16, 4], strides = [1, 1, 1]} : vector<18x18x4xf32> to vector<16x16x4xf32>
    %22 = vector.shape_cast %21 : vector<16x16x4xf32> to vector<256x4xf32>
    %c0_8 = arith.constant 0 : index
    %c16 = arith.constant 16 : index
    %23 = vector.load %arg10[%c0_8, %c16] : memref<256x128xf32, #tpu.memory_space<vmem>>, vector<256x4xf32>
    tpu.vector_store %arg10[%c0_8, %c16], %22 {strides = array<i32>} : memref<256x128xf32, #tpu.memory_space<vmem>>, vector<256x4xf32>,
    %24 = vector.extract_strided_slice %8 {offsets = [1, 2, 0], sizes = [16, 16, 4], strides = [1, 1, 1]} : vector<18x18x4xf32> to vector<16x16x4xf32>
    %25 = vector.shape_cast %24 : vector<16x16x4xf32> to vector<256x4xf32>
    %c0_9 = arith.constant 0 : index
    %c20 = arith.constant 20 : index
    %26 = vector.load %arg10[%c0_9, %c20] : memref<256x128xf32, #tpu.memory_space<vmem>>, vector<256x4xf32>
    tpu.vector_store %arg10[%c0_9, %c20], %25 {strides = array<i32>} : memref<256x128xf32, #tpu.memory_space<vmem>>, vector<256x4xf32>,
    %27 = vector.extract_strided_slice %8 {offsets = [2, 0, 0], sizes = [16, 16, 4], strides = [1, 1, 1]} : vector<18x18x4xf32> to vector<16x16x4xf32>
    %28 = vector.shape_cast %27 : vector<16x16x4xf32> to vector<256x4xf32>
    %c0_10 = arith.constant 0 : index
    %c24 = arith.constant 24 : index
    %29 = vector.load %arg10[%c0_10, %c24] : memref<256x128xf32, #tpu.memory_space<vmem>>, vector<256x4xf32>
    tpu.vector_store %arg10[%c0_10, %c24], %28 {strides = array<i32>} : memref<256x128xf32, #tpu.memory_space<vmem>>, vector<256x4xf32>,
    %30 = vector.extract_strided_slice %8 {offsets = [2, 1, 0], sizes = [16, 16, 4], strides = [1, 1, 1]} : vector<18x18x4xf32> to vector<16x16x4xf32>
    %31 = vector.shape_cast %30 : vector<16x16x4xf32> to vector<256x4xf32>
    %c0_11 = arith.constant 0 : index
    %c28 = arith.constant 28 : index
    %32 = vector.load %arg10[%c0_11, %c28] : memref<256x128xf32, #tpu.memory_space<vmem>>, vector<256x4xf32>
    tpu.vector_store %arg10[%c0_11, %c28], %31 {strides = array<i32>} : memref<256x128xf32, #tpu.memory_space<vmem>>, vector<256x4xf32>,
    %33 = vector.extract_strided_slice %8 {offsets = [2, 2, 0], sizes = [16, 16, 4], strides = [1, 1, 1]} : vector<18x18x4xf32> to vector<16x16x4xf32>
    %34 = vector.shape_cast %33 : vector<16x16x4xf32> to vector<256x4xf32>
    %c0_12 = arith.constant 0 : index
    %c32 = arith.constant 32 : index
    %35 = vector.load %arg10[%c0_12, %c32] : memref<256x128xf32, #tpu.memory_space<vmem>>, vector<256x4xf32>
    tpu.vector_store %arg10[%c0_12, %c32], %34 {strides = array<i32>} : memref<256x128xf32, #tpu.memory_space<vmem>>, vector<256x4xf32>,
    %c0_13 = arith.constant 0 : index
    %c0_14 = arith.constant 0 : index
    %36 = vector.load %arg10[%c0_13, %c0_14] : memref<256x128xf32, #tpu.memory_space<vmem>>, vector<256x128xf32>
    %37 = arith.truncf %36 : vector<256x128xf32> to vector<256x128xbf16>
    %c0_15 = arith.constant 0 : index
    %c0_16 = arith.constant 0 : index
    %38 = vector.load %arg3[%c0_15, %c0_16] : memref<128x128xbf16, #tpu.memory_space<vmem>>, vector<128x128xbf16>
    %cst = arith.constant dense<0.000000e+00> : vector<256x128xf32>
    %39 = tpu.matmul %37, %38, %cst {dimension_numbers = #tpu.dot_dimension_numbers<[1], [0], [0], [1], [0, 0, 1, 1], [], []>} : vector<256x128xbf16>, vector<128x128xbf16>, vector<256x128xf32> -> vector<256x128xf32>
    %c0_17 = arith.constant 0 : index
    %c0_18 = arith.constant 0 : index
    %40 = vector.load %arg4[%c0_17, %c0_18] : memref<1x128xf32, #tpu.memory_space<vmem>>, vector<1x128xf32>
    %41 = vector.broadcast %40 : vector<1x128xf32> to vector<256x128xf32>
    %42 = arith.addf %39, %41 : vector<256x128xf32>
    %cst_19 = arith.constant 0.000000e+00 : f32
    %43 = vector.broadcast %cst_19 : f32 to vector<256x128xf32>
    %44 = arith.maximumf %42, %43 : vector<256x128xf32>
    %45 = arith.truncf %44 : vector<256x128xf32> to vector<256x128xbf16>
    %c0_20 = arith.constant 0 : index
    %c0_21 = arith.constant 0 : index
    %46 = vector.load %arg5[%c0_20, %c0_21] : memref<128x128xbf16, #tpu.memory_space<vmem>>, vector<128x128xbf16>
    %cst_22 = arith.constant dense<0.000000e+00> : vector<256x128xf32>
    %47 = tpu.matmul %45, %46, %cst_22 {dimension_numbers = #tpu.dot_dimension_numbers<[1], [0], [0], [1], [0, 0, 1, 1], [], []>} : vector<256x128xbf16>, vector<128x128xbf16>, vector<256x128xf32> -> vector<256x128xf32>
    %c0_23 = arith.constant 0 : index
    %c0_24 = arith.constant 0 : index
    %48 = vector.load %arg6[%c0_23, %c0_24] : memref<1x128xf32, #tpu.memory_space<vmem>>, vector<1x128xf32>
    %49 = vector.broadcast %48 : vector<1x128xf32> to vector<256x128xf32>
    %50 = arith.addf %47, %49 : vector<256x128xf32>
    %cst_25 = arith.constant 0.000000e+00 : f32
    %51 = vector.broadcast %cst_25 : f32 to vector<256x128xf32>
    %52 = arith.maximumf %50, %51 : vector<256x128xf32>
    %c0_26 = arith.constant 0 : index
    %c0_27 = arith.constant 0 : index
    %53 = vector.load %arg11[%c0_26, %c0_27] : memref<1x128xf32, #tpu.memory_space<vmem>>, vector<1x128xf32>
    %cst_28 = arith.constant dense<0.000000e+00> : vector<128xf32>
    %54 = vector.multi_reduction <add>, %52, %cst_28 [0] : vector<256x128xf32> to vector<128xf32>
    %55 = vector.shape_cast %54 : vector<128xf32> to vector<1x128xf32>
    %56 = arith.addf %53, %55 : vector<1x128xf32>
    %c0_29 = arith.constant 0 : index
    %c0_30 = arith.constant 0 : index
    %57 = vector.load %arg11[%c0_29, %c0_30] : memref<1x128xf32, #tpu.memory_space<vmem>>, vector<1x128xf32>
    tpu.vector_store %arg11[%c0_29, %c0_30], %56 {strides = array<i32>} : memref<1x128xf32, #tpu.memory_space<vmem>>, vector<1x128xf32>,
    %c0_i32_31 = arith.constant 0 : i32
    %58 = arith.cmpi eq, %arg1, %c0_i32_31 : i32
    %59 = arith.extui %58 : i1 to i32
    %c0_i32_32 = arith.constant 0 : i32
    %60 = arith.cmpi ne, %59, %c0_i32_32 : i32
    scf.if %60 {
      %c0_33 = arith.constant 0 : index
      %c0_34 = arith.constant 0 : index
      %61 = vector.load %arg11[%c0_33, %c0_34] : memref<1x128xf32, #tpu.memory_space<vmem>>, vector<1x128xf32>
      %cst_35 = arith.constant 3.906250e-03 : f32
      %62 = vector.broadcast %cst_35 : f32 to vector<1x128xf32>
      %63 = arith.mulf %61, %62 : vector<1x128xf32>
      %64 = arith.truncf %63 : vector<1x128xf32> to vector<1x128xbf16>
      %65 = vector.shape_cast %64 : vector<1x128xbf16> to vector<1x128xbf16>
      %66 = vector.broadcast %65 : vector<1x128xbf16> to vector<8x128xbf16>
      %c0_36 = arith.constant 0 : index
      %c0_37 = arith.constant 0 : index
      %67 = vector.load %arg7[%c0_36, %c0_37] : memref<128x128xbf16, #tpu.memory_space<vmem>>, vector<128x128xbf16>
      %cst_38 = arith.constant dense<0.000000e+00> : vector<8x128xf32>
      %68 = tpu.matmul %66, %67, %cst_38 {dimension_numbers = #tpu.dot_dimension_numbers<[1], [0], [0], [1], [0, 0, 1, 1], [], []>} : vector<8x128xbf16>, vector<128x128xbf16>, vector<8x128xf32> -> vector<8x128xf32>
      %c0_39 = arith.constant 0 : index
      %c0_40 = arith.constant 0 : index
      %69 = vector.load %arg8[%c0_39, %c0_40] : memref<1x128xf32, #tpu.memory_space<vmem>>, vector<1x128xf32>
      %70 = vector.broadcast %69 : vector<1x128xf32> to vector<8x128xf32>
      %71 = arith.addf %68, %70 : vector<8x128xf32>
      %72 = vector.extract_strided_slice %71 {offsets = [0, 0], sizes = [1, 128], strides = [1, 1]} : vector<8x128xf32> to vector<1x128xf32>
      %c0_41 = arith.constant 0 : index
      %c0_42 = arith.constant 0 : index
      %c0_43 = arith.constant 0 : index
      %73 = vector.load %arg9[%c0_41, %c0_42, %c0_43] : memref<1x1x128xf32, #tpu.memory_space<vmem>>, vector<1x1x128xf32>
      %74 = vector.shape_cast %73 : vector<1x1x128xf32> to vector<1x128xf32>
      %75 = vector.shape_cast %72 : vector<1x128xf32> to vector<1x1x128xf32>
      tpu.vector_store %arg9[%c0_41, %c0_42, %c0_43], %75 {strides = array<i32>} : memref<1x1x128xf32, #tpu.memory_space<vmem>>, vector<1x1x128xf32>,
    } else {
    }
    return
  }
  func.func @transform_0(%arg0: i32, %arg1: i32) -> (i32, i32, i32, i32) {
    %c0_i32 = arith.constant 0 : i32
    %c0_i32_0 = arith.constant 0 : i32
    %c0_i32_1 = arith.constant 0 : i32
    %c0_i32_2 = arith.constant 0 : i32
    return %arg0, %c0_i32, %c0_i32_0, %c0_i32_1 : i32, i32, i32, i32
  }
  func.func @transform_1(%arg0: i32, %arg1: i32) -> (i32, i32) {
    %c0_i32 = arith.constant 0 : i32
    %c0_i32_0 = arith.constant 0 : i32
    %c0_i32_1 = arith.constant 0 : i32
    return %c0_i32, %c0_i32_0 : i32, i32
  }
  func.func @transform_2(%arg0: i32, %arg1: i32) -> (i32, i32) {
    %c0_i32 = arith.constant 0 : i32
    %c0_i32_0 = arith.constant 0 : i32
    %c0_i32_1 = arith.constant 0 : i32
    return %c0_i32, %c0_i32_0 : i32, i32
  }
  func.func @transform_3(%arg0: i32, %arg1: i32) -> (i32, i32) {
    %c0_i32 = arith.constant 0 : i32
    %c0_i32_0 = arith.constant 0 : i32
    %c0_i32_1 = arith.constant 0 : i32
    return %c0_i32, %c0_i32_0 : i32, i32
  }
  func.func @transform_4(%arg0: i32, %arg1: i32) -> (i32, i32) {
    %c0_i32 = arith.constant 0 : i32
    %c0_i32_0 = arith.constant 0 : i32
    %c0_i32_1 = arith.constant 0 : i32
    return %c0_i32, %c0_i32_0 : i32, i32
  }
  func.func @transform_5(%arg0: i32, %arg1: i32) -> (i32, i32) {
    %c0_i32 = arith.constant 0 : i32
    %c0_i32_0 = arith.constant 0 : i32
    %c0_i32_1 = arith.constant 0 : i32
    return %c0_i32, %c0_i32_0 : i32, i32
  }
  func.func @transform_6(%arg0: i32, %arg1: i32) -> (i32, i32) {
    %c0_i32 = arith.constant 0 : i32
    %c0_i32_0 = arith.constant 0 : i32
    %c0_i32_1 = arith.constant 0 : i32
    return %c0_i32, %c0_i32_0 : i32, i32
  }
  func.func @transform_7(%arg0: i32, %arg1: i32) -> (i32, i32, i32) {
    %c0_i32 = arith.constant 0 : i32
    %c0_i32_0 = arith.constant 0 : i32
    %c0_i32_1 = arith.constant 0 : i32
    return %arg0, %c0_i32, %c0_i32_0 : i32, i32, i32
  }
}

</mosaic_0001>

<bundles_post_ra>
// kernel: timm_model_forward.1
= control target key start
LH: loop header
LB: loop body
LE: loop exit
PB: predicated region body
PF: predicated region fallthrough
CT: control target
= control target key end

     0   :  { %12 = vsyncpa [#allocation5], 0  ;;  %s4774_s0 = inlined_call_operand.vmem [shape: bf16[2,18,18,4], index: 0, kind: input, shape index: {}]   ;;  %s4775_s1 = inlined_call_operand.vmem [shape: bf16[128,128], index: 1, kind: input, shape index: {}]   ;;  %s4776_s2 = inlined_call_operand.vmem [shape: f32[1,128], index: 2, kind: input, shape index: {}]   ;;  %s4777_s3 = inlined_call_operand.vmem [shape: bf16[128,128], index: 3, kind: input, shape index: {}]   ;;  %s4778_s4 = inlined_call_operand.vmem [shape: f32[1,128], index: 4, kind: input, shape index: {}]   ;;  %s4779_s5 = inlined_call_operand.vmem [shape: bf16[128,128], index: 5, kind: input, shape index: {}]   ;;  %s4780_s6 = inlined_call_operand.vmem [shape: f32[1,128], index: 6, kind: input, shape index: {}]   ;;  %s4781_s7 = inlined_call_operand.hbm [shape: f32[2,1,128], index: 7, kind: output, shape index: {}]  }
   0x1   :  { %14 = vsyncpa [#allocation5 + $0x1], 0  ;;  %s3686_s24 = smov 0   ;;  %s3688_s25 = smov 0  }
   0x2   :  { %s3690_s26 = smov 0   ;;  %s3692_s27 = smov 0  }
   0x3   :  { %s3694_s28 = smov 0   ;;  %s3696_s29 = smov 0  }
   0x4 LB: > { %s2574_s30 = sadd.s32 4294967295, %s3633_s29   ;;  %s2575_s8 = sadd.s32 4294967294, %s3633_s29   ;;  %s3633_s29 = sphi %s3696_s29, %s20_s29   ;;  %s3629_s28 = sphi %s3694_s28, %s4788_s28   ;;  %s3625_s27 = sphi %s3692_s27, %s4787_s27   ;;  %s3621_s26 = sphi %s3690_s26, %s4786_s26   ;;  %s3617_s25 = sphi %s3688_s25, %s4785_s25   ;;  %s3613_s24 = sphi %s3686_s24, %s4784_s24  }
   0x5   : > { %s32_s9 = sadd.s32 1, %s3629_s28  ;;  %s191_s10 = sadd.s32 1, %s3621_s26 }
   0x6   : > { %p34_p0 = scmp.ge.s32.totalorder %s32_s9, 2  ;;  %p201_p1 = scmp.ne.s32.totalorder %s3621_s26, %s3617_s25 }
   0x7   : > { %p202_p2 = scmp.eq.s32.totalorder %s2574_s30, 1  ;;  %p207_p3 = scmp.ne.s32.totalorder %s3617_s25, %s3613_s24 }
   0x8   : > { %s4790_s9 = smov (%p34_p0, %s32_s9), 0  ;;  %p208_p5 = scmp.eq.s32.totalorder %s2575_s8, 1 }
   0x9   : > { %p3726_p4 = por %p202_p2, %p201_p1  ;;  %s188_s12 = ssub.s32 %s3629_s28, %s4790_s9 }
   0xa   : > { %p2578_p6 = scmp.ge.s32.totalorder %s3633_s29, 1  ;;  %p189_p7 = scmp.eq.s32.totalorder %s188_s12, 0 }
   0xb   : > { %p3733_p8 = por %p208_p5, %p207_p3  ;;  %p252_p9 = scmp.lt.s32.totalorder %s3633_s29, 3 }
   0xc   : > { %s3739_s14 = scalar_select %p189_p7, %s3621_s26, %s191_s10  }
   0xd   : > { %p253_p10 = pnand %p2578_p6, %p252_p9 }
   0xe   : > { %p283_p11 = scmp.lt.s32.totalorder (!%p253_p10), %s3625_s27, 1  ;;  %s3636_s20 = smov (!%p253_p10), 12  }
   0xf   : > { %256 = sbr.rel (%p253_p10) target bundleno = 1064 (0x428), region = 48  ;;  %s3637_s8 = smov (!%p253_p10), 4  }
  0x10   : > { %s3638_s10 = smov (!%p253_p10), 8   ;;  %s3639_s18 = smov (!%p253_p10), 16  }
  0x11   : > { %s3640_s23 = smov (!%p253_p10), 20   ;;  %s3642_s21 = smov (!%p253_p10), 28  }
  0x12   : > { %s3643_s12 = smov (!%p253_p10), 32   ;;  %s281_s22 = sand.u32 (!%p253_p10), 1, %s3617_s25  }
  0x13   : > { %s2607_s17 = sshll.u32 (!%p253_p10), %s3625_s27, 4 }
  0x14   : > { %s3743_s15 = scalar_select %p283_p11, %s3625_s27, 1  ;;  %v3635_v0 = vmov 0.0   ;;  %vm519_vm0 = vcmask 1046528   ;;  %vm729_vm1 = vcmask 1045504   ;;  %vm438_vm2 = vcmask 31744   ;;  %v3533_v35 = vld [vmem:[%s4775_s1 + $0x38] sm:$0xff]  }
  0x15   : > { %294 = vst [vmem:[#allocation2] sm:$0xff] %v3635_v0  ;;  %295 = vst [vmem:[#allocation2 + $0x8] sm:$0xff] %v3635_v0  ;;  %v3534_v39 = vld [vmem:[%s4775_s1 + $0x30] sm:$0xff]   ;;  %2711 = vmatprep.subr.bf16.mxu0 %v3533_v35  ;;  %v3535_v56 = vld [vmem:[%s4775_s1 + $0x28] sm:$0xff]   ;;  %vm696_vm3 = vcmask 64544   ;;  %vm906_vm4 = vcmask 97344  }
  0x16   : > { %293 = vst [vmem:[#allocation3] sm:$0x1] %v3635_v0  ;;  %296 = vst [vmem:[#allocation2 + $0x10] sm:$0xff] %v3635_v0  ;;  %s2827_s16 = smul.u32 216, %s3743_s15  ;;  %2712 = vmatpush3.bf16.msra.mxu0 %v3533_v35  ;;  %s3641_s15 = smov 24   ;;  %vm1037_vm5 = vcmask 130144  }
  0x17   : > { %297 = vst [vmem:[#allocation2 + $0x18] sm:$0xff] %v3635_v0  ;;  %298 = vst [vmem:[#allocation2 + $0x20] sm:$0xff] %v3635_v0  ;;  %2713 = vmatprep.subr.bf16.mxu0 %v3534_v39  ;;  %vm1172_vm6 = vcmask 162944   ;;  %vm1306_vm7 = vcmask 195744   ;;  %vm1437_vm8 = vcmask 228544   ;;  %vm1572_vm9 = vcmask 261344  }
  0x18   : > { %299 = vst [vmem:[#allocation2 + $0x28] sm:$0xff] %v3635_v0  ;;  %300 = vst [vmem:[#allocation2 + $0x30] sm:$0xff] %v3635_v0  ;;  %s3782_s19 = scalar_lea.vmem %s4774_s0, %s2827_s16  ;;  %vm1706_vm10 = vcmask 294144   ;;  %vm3644_vm11 = vmmov 0   ;;  %s3645_s27 = smov [#allocation4]  }
  0x19   : > { %301 = vst [vmem:[#allocation2 + $0x38] sm:$0xff] %v3635_v0  ;;  %302 = vst [vmem:[#allocation2 + $0x40] sm:$0xff] %v3635_v0  ;;  %v333_v1 = vld [vmem:[%s3782_s19 + $0xc] sm:$0xff]   ;;  %v2646_v2 = vld [vmem:[%s3782_s19 + $0x18] sm:$0xff]  }
  0x1a   : > { %303 = vst [vmem:[#allocation2 + $0x48] sm:$0xff] %v3635_v0  ;;  %304 = vst [vmem:[#allocation2 + $0x50] sm:$0xff] %v3635_v0  ;;  %v2611_v3 = vld [vmem:[%s3782_s19] sm:$0xff]   ;;  %v387_v4 = vunpack.c.l.bf16 %v333_v1  ;;  %v388_v5 = vunpack.c.h.bf16 %v333_v1  ;;  %v3787_v6 = vunpack.c.l.bf16 %v2646_v2  ;;  %v3789_v7 = vunpack.c.h.bf16 %v2646_v2  ;;  %v332_v8 = vld [vmem:[%s3782_s19 + $0x8] sm:$0x1]  ;;  %2714 = vmatpush3.bf16.msra.mxu0 %v3534_v39 }
  0x1b   : > { %305 = vst [vmem:[#allocation2 + $0x58] sm:$0xff] %v3635_v0  ;;  %306 = vst [vmem:[#allocation2 + $0x60] sm:$0xff] %v3635_v0  ;;  %v335_v9 = vld [vmem:[%s3782_s19 + $0x14] sm:$0x1]  ;;  %v2612_v10 = vunpack.c.l.bf16 %v2611_v3  ;;  %v2613_v11 = vunpack.c.h.bf16 %v2611_v3  ;;  %v386_v12 = vunpack.c.l.bf16 %v332_v8  ;;  %v338_v30 = vld [vmem:[%s3782_s19 + $0x20] sm:$0x1]  ;;  %2715 = vmatprep.subr.bf16.mxu0 %v3535_v56 }
  0x1c   : > { %307 = vst [vmem:[#allocation2 + $0x68] sm:$0xff] %v3635_v0  ;;  %308 = vst [vmem:[#allocation2 + $0x70] sm:$0xff] %v3635_v0  ;;  %v389_v13 = vunpack.c.l.bf16 %v335_v9  ;;  %v2893_v14 = vpack.i.bf16 %v388_v5, %v387_v4  ;;  %v3795_v15 = vpack.i.bf16 %v3789_v7, %v3787_v6  ;;  %v525_v16 = vrot.slane %v387_v4, 1  ;;  %v339_v44 = vld [vmem:[%s3782_s19 + $0x24] sm:$0xff]   ;;  %v341_v47 = vld [vmem:[%s3782_s19 + $0x2c] sm:$0x1] }
  0x1d   : > { %309 = vst [vmem:[#allocation2 + $0x78] sm:$0xff] %v3635_v0  ;;  %310 = vst [vmem:[#allocation2 + $0x80] sm:$0xff] %v3635_v0  ;;  %v526_v17 = vrot.slane %v388_v5, 1  ;;  %v520_v18 = vrot.slane %v2612_v10, 1  ;;  %v521_v19 = vrot.slane %v2613_v11, 1  ;;  %v523_v20 = vrot.slane %v386_v12, 1 }
  0x1e   : > { %311 = vst [vmem:[#allocation2 + $0x88] sm:$0xff] %v3635_v0  ;;  %312 = vst [vmem:[#allocation2 + $0x90] sm:$0xff] %v3635_v0  ;;  %v730_v21 = vrot.slane %v2612_v10, 2  ;;  %2894 = vrot.lane.b32.xlu0 %v2893_v14, %s3636_s20  ;;  %2899 = vrot.lane.b32.xlu1 %v3795_v15, %s3636_s20  ;;  %v731_v22 = vrot.slane %v2613_v11, 2  ;;  %v733_v23 = vrot.slane %v386_v12, 2  ;;  %v528_v25 = vrot.slane %v389_v13, 1 }
  0x1f   : > { %313 = vst [vmem:[#allocation2 + $0x98] sm:$0xff] %v3635_v0  ;;  %314 = vst [vmem:[#allocation2 + $0xa0] sm:$0xff] %v3635_v0  ;;  %v527_v24 = vsel %vm519_vm0, %v525_v16, %v526_v17  ;;  %v522_v26 = vsel %vm519_vm0, %v520_v18, %v521_v19  ;;  %v524_v27 = vsel %vm519_vm0, %v521_v19, %v523_v20  ;;  %v735_v28 = vrot.slane %v387_v4, 2  ;;  %v2647_v48 = vld [vmem:[%s3782_s19 + $0x30] sm:$0xff]   ;;  %v3536_v1 = vld [vmem:[%s4775_s1 + $0x20] sm:$0xff]  }
  0x20   : > { %315 = vst [vmem:[#allocation2 + $0xa8] sm:$0xff] %v3635_v0  ;;  %316 = vst [vmem:[#allocation2 + $0xb0] sm:$0xff] %v3635_v0  ;;  %v736_v29 = vrot.slane %v388_v5, 2  ;;  %v2903_v31 = vpack.i.bf16 %v524_v27, %v522_v26  ;;  %v732_v32 = vsel %vm729_vm1, %v730_v21, %v731_v22  ;;  %v734_v33 = vsel %vm729_vm1, %v731_v22, %v733_v23  ;;  %v345_v3 = vld [vmem:[%s3782_s19 + $0x3c] sm:$0xff]   ;;  %v347_v20 = vld [vmem:[%s3782_s19 + $0x44] sm:$0x1] }
  0x21   : > { %317 = vst [vmem:[#allocation2 + $0xb8] sm:$0xff] %v3635_v0  ;;  %318 = vst [vmem:[#allocation2 + $0xc0] sm:$0xff] %v3635_v0  ;;  %v529_v34 = vsel %vm519_vm0, %v526_v17, %v528_v25  ;;  %v2913_v36 = vpack.i.bf16 %v734_v33, %v732_v32  ;;  %v738_v38 = vrot.slane %v389_v13, 2  ;;  %v392_v41 = vunpack.c.l.bf16 %v338_v30  ;;  %2716 = vmatpush3.bf16.msra.mxu0 %v3535_v56  ;;  %v3538_v17 = vld [vmem:[%s4775_s1 + $0x10] sm:$0xff]   ;;  %v2648_v21 = vld [vmem:[%s3782_s19 + $0x48] sm:$0xff]  }
  0x22   : > { %319 = vst [vmem:[#allocation2 + $0xc8] sm:$0xff] %v3635_v0  ;;  %320 = vst [vmem:[#allocation2 + $0xd0] sm:$0xff] %v3635_v0  ;;  %v737_v37 = vsel %vm729_vm1, %v735_v28, %v736_v29  ;;  %2904 = vrot.lane.b32.xlu0 %v2903_v31, %s3637_s8  ;;  %v2908_v40 = vpack.i.bf16 %v529_v34, %v527_v24  ;;  %v530_v42 = vrot.slane %v3787_v6, 1  ;;  %v531_v43 = vrot.slane %v3789_v7, 1  ;;  %v351_v30 = vld [vmem:[%s3782_s19 + $0x54] sm:$0xff]   ;;  %v2649_v35 = vld [vmem:[%s3782_s19 + $0x60] sm:$0xff]  }
  0x23   : > { %321 = vst [vmem:[#allocation2 + $0xd8] sm:$0xff] %v3635_v0  ;;  %322 = vst [vmem:[#allocation2 + $0xe0] sm:$0xff] %v3635_v0  ;;  %2914 = vrot.lane.b32.xlu1 %v2913_v36, %s3638_s10  ;;  %v739_v45 = vsel %vm729_vm1, %v736_v29, %v738_v38  ;;  %v740_v46 = vrot.slane %v3787_v6, 2  ;;  %v533_v51 = vrot.slane %v392_v41, 1  ;;  %v741_v52 = vrot.slane %v3789_v7, 2  ;;  %2717 = vmatprep.subr.bf16.mxu0 %v3536_v1  ;;  %v3540_v38 = vld [vmem:[%s4775_s1] sm:$0xff]  }
  0x24   : > { %323 = vst [vmem:[#allocation2 + $0xe8] sm:$0xff] %v3635_v0  ;;  %324 = vst [vmem:[#allocation2 + $0xf0] sm:$0xff] %v3635_v0  ;;  %v2918_v49 = vpack.i.bf16 %v739_v45, %v737_v37  ;;  %v532_v50 = vsel %vm519_vm0, %v530_v42, %v531_v43  ;;  %v743_v53 = vrot.slane %v392_v41, 2  ;;  %v393_v54 = vunpack.c.l.bf16 %v339_v44  ;;  %v356_v56 = vld [vmem:[%s3782_s19 + $0x68] sm:$0x1] }
  0x25   : > { %325 = vst [vmem:[#allocation2 + $0xf8] sm:$0xff] %v3635_v0  ;;  %441 = vst.msk [vmem:[#allocation2 + $0x10] sm:$0xff] %vm438_vm2, %v387_v4  ;;  %v394_v55 = vunpack.c.h.bf16 %v339_v44  ;;  %v534_v57 = vsel %vm519_vm0, %v531_v43, %v533_v51  ;;  %v3838_v58 = vunpack.c.l.bf16 %v2647_v48  ;;  %v3840_v59 = vunpack.c.h.bf16 %v2647_v48  ;;  %2718 = vmatpush3.bf16.msra.mxu0 %v3536_v1 }
  0x26   : > { %442 = vst.msk [vmem:[#allocation2 + $0x18] sm:$0xff] %vm438_vm2, %v388_v5  ;;  %443 = vst.msk [vmem:[#allocation2 + $0x20] sm:$0xff] %vm438_vm2, %v3787_v6  ;;  %2909 = vrot.lane.b32.xlu0 %v2908_v40, %s3637_s8  ;;  %v3843_v60 = vpack.i.bf16 %v534_v57, %v532_v50  ;;  %v395_v61 = vunpack.c.l.bf16 %v341_v47  ;;  %v742_v62 = vsel %vm729_vm1, %v740_v46, %v741_v52  ;;  %v535_v2 = vrot.slane %v393_v54, 1 }
  0x27   : > { %444 = vst.msk [vmem:[#allocation2 + $0x28] sm:$0xff] %vm438_vm2, %v3789_v7  ;;  %440 = vst.msk [vmem:[#allocation2 + $0x8] sm:$0xff] %vm438_vm2, %v2613_v11  ;;  %2919 = vrot.lane.b32.xlu1 %v2918_v49, %s3638_s10  ;;  %v744_v63 = vsel %vm729_vm1, %v741_v52, %v743_v53  ;;  %v536_v5 = vrot.slane %v394_v55, 1  ;;  %v3537_v7 = vld [vmem:[%s4775_s1 + $0x18] sm:$0xff]   ;;  %v3868_v8 = vpack.i.bf16 %v394_v55, %v393_v54  ;;  %v745_v9 = vrot.slane %v393_v54, 2 }
  0x28   : > { %439 = vst.msk [vmem:[#allocation2] sm:$0xff] %vm438_vm2, %v2612_v10  ;;  %445 = vst.msk [vmem:[#allocation2 + $0x30] sm:$0xff] %vm438_vm2, %v393_v54  ;;  %v3860_v4 = vpack.i.bf16 %v744_v63, %v742_v62  ;;  %v538_v6 = vrot.slane %v395_v61, 1  ;;  %v344_v10 = vld [vmem:[%s3782_s19 + $0x38] sm:$0x1]  ;;  %v3871_v11 = vunpack.c.l.bf16 %v345_v3  ;;  %v3875_v14 = vunpack.c.h.bf16 %v345_v3  ;;  %2719 = vmatprep.subr.bf16.mxu0 %v3537_v7  ;;  %v357_v62 = vld [vmem:[%s3782_s19 + $0x6c] sm:$0xff]  }
  0x29   : > { %446 = vst.msk [vmem:[#allocation2 + $0x38] sm:$0xff] %vm438_vm2, %v394_v55  ;;  %447 = vst.msk [vmem:[#allocation2 + $0x40] sm:$0xff] %vm438_vm2, %v3838_v58  ;;  %v537_v12 = vsel %vm519_vm0, %v535_v2, %v536_v5  ;;  %v746_v16 = vrot.slane %v394_v55, 2  ;;  %v748_v18 = vrot.slane %v395_v61, 2  ;;  %v398_v22 = vunpack.c.l.bf16 %v344_v10  ;;  %2720 = vmatpush3.bf16.msra.mxu0 %v3537_v7  ;;  %v359_v3 = vld [vmem:[%s3782_s19 + $0x74] sm:$0x1] }
  0x2a   : > { %448 = vst.msk [vmem:[#allocation2 + $0x48] sm:$0xff] %vm438_vm2, %v3840_v59  ;;  %2924 = vrot.lane.b32.xlu0 %v2908_v40, %s3639_s18  ;;  %v539_v13 = vsel %vm519_vm0, %v536_v5, %v538_v6  ;;  %449 = vst.msk [vmem:[#allocation2 + $0x50] sm:$0xff] %vm438_vm2, %v3871_v11  ;;  %2721 = vmatprep.subr.bf16.mxu0 %v3538_v17  ;;  %v401_v25 = vunpack.c.l.bf16 %v347_v20  ;;  %v3899_v26 = vunpack.c.l.bf16 %v2648_v21  ;;  %v3901_v27 = vunpack.c.h.bf16 %v2648_v21 }
  0x2b   : > { %2929 = vrot.lane.b32.xlu1 %v3843_v60, %s3639_s18  ;;  %450 = vst.msk [vmem:[#allocation2 + $0x58] sm:$0xff] %vm438_vm2, %v3875_v14  ;;  %v3888_v19 = vpack.i.bf16 %v539_v13, %v537_v12  ;;  %v747_v23 = vsel %vm729_vm1, %v745_v9, %v746_v16  ;;  %v749_v24 = vsel %vm729_vm1, %v746_v16, %v748_v18  ;;  %v540_v28 = vrot.slane %v3838_v58, 1 }
  0x2c   : > { %v541_v29 = vrot.slane %v3840_v59, 1  ;;  %v543_v31 = vrot.slane %v398_v22, 1  ;;  %v750_v32 = vrot.slane %v3838_v58, 2  ;;  %v751_v33 = vrot.slane %v3840_v59, 2  ;;  %451 = vst.msk [vmem:[#allocation2 + $0x60] sm:$0xff] %vm438_vm2, %v3899_v26  ;;  %452 = vst.msk [vmem:[#allocation2 + $0x68] sm:$0xff] %vm438_vm2, %v3901_v27 }
  0x2d   : > { %v753_v34 = vrot.slane %v398_v22, 2  ;;  %2722 = vmatpush3.bf16.msra.mxu0 %v3538_v17  ;;  %v3915_v36 = vpack.i.bf16 %v749_v24, %v747_v23  ;;  %v545_v37 = vrot.slane %v3871_v11, 1  ;;  %v546_v39 = vrot.slane %v3875_v14, 1 }
  0x2e   : > { %2934 = vrot.lane.b32.xlu0 %v2918_v49, %s3640_s23  ;;  %v548_v40 = vrot.slane %v401_v25, 1  ;;  %v3924_v41 = vunpack.c.l.bf16 %v351_v30  ;;  %v3926_v42 = vunpack.c.h.bf16 %v351_v30  ;;  %v3932_v43 = vpack.i.bf16 %v3840_v59, %v3838_v58  ;;  %v2650_v30 = vld [vmem:[%s3782_s19 + $0x78] sm:$0xff]  }
  0x2f   : > { %2939 = vrot.lane.b32.xlu1 %v3860_v4, %s3640_s23  ;;  %v2628_v44 = vunpack.c.l.bf16 %v2649_v35  ;;  %v542_v45 = vsel %vm519_vm0, %v540_v28, %v541_v29  ;;  %v544_v46 = vsel %vm519_vm0, %v541_v29, %v543_v31  ;;  %v752_v47 = vsel %vm729_vm1, %v750_v32, %v751_v33  ;;  %v4001_v32 = vld [vmem:[%s3782_s19 + $0x50] sm:$0x1] }
  0x30   : > { %v754_v48 = vsel %vm729_vm1, %v751_v33, %v753_v34  ;;  %453 = vst.msk [vmem:[#allocation2 + $0x70] sm:$0xff] %vm438_vm2, %v3924_v41  ;;  %454 = vst.msk [vmem:[#allocation2 + $0x78] sm:$0xff] %vm438_vm2, %v3926_v42  ;;  %v755_v49 = vrot.slane %v3871_v11, 2  ;;  %v756_v50 = vrot.slane %v3875_v14, 2  ;;  %v547_v51 = vsel %vm519_vm0, %v545_v37, %v546_v39  ;;  %v362_v34 = vld [vmem:[%s3782_s19 + $0x80] sm:$0x1] }
  0x31   : > { %455 = vst.msk [vmem:[#allocation2 + $0x80] sm:$0xff] %vm438_vm2, %v2628_v44  ;;  %v549_v52 = vsel %vm519_vm0, %v546_v39, %v548_v40  ;;  %v3951_v53 = vpack.i.bf16 %v544_v46, %v542_v45  ;;  %v3953_v54 = vpack.i.bf16 %v754_v48, %v752_v47  ;;  %v3957_v55 = vpack.i.bf16 %v3926_v42, %v3924_v41  ;;  %v363_v46 = vld [vmem:[%s3782_s19 + $0x84] sm:$0xff]  }
  0x32   : > { %2944 = vrot.lane.b32.xlu0 %v3795_v15, %s3641_s15  ;;  %v3539_v15 = vld [vmem:[%s4775_s1 + $0x8] sm:$0xff]   ;;  %v3962_v57 = vpack.i.bf16 %v3875_v14, %v3871_v11  ;;  %v758_v58 = vrot.slane %v401_v25, 2  ;;  %v3964_v59 = vpack.i.bf16 %v549_v52, %v547_v51  ;;  %v2629_v61 = vunpack.c.h.bf16 %v2649_v35 }
  0x33   : > { %2949 = vrot.lane.b32.xlu1 %v3868_v8, %s3641_s15  ;;  %2723 = vmatprep.subr.bf16.mxu0 %v3539_v15  ;;  %v410_v63 = vunpack.c.l.bf16 %v356_v56  ;;  %v560_v1 = vrot.slane %v2628_v44, 1  ;;  %v770_v2 = vrot.slane %v2628_v44, 2  ;;  %v411_v11 = vunpack.c.l.bf16 %v357_v62 }
  0x34   : > { %2724 = vmatpush3.bf16.msra.mxu0 %v3539_v15  ;;  %v3974_v5 = vpack.i.bf16 %v2629_v61, %v2628_v44  ;;  %v561_v6 = vrot.slane %v2629_v61, 1  ;;  %v771_v7 = vrot.slane %v2629_v61, 2  ;;  %456 = vst.msk [vmem:[#allocation2 + $0x88] sm:$0xff] %vm438_vm2, %v2629_v61  ;;  %v412_v12 = vunpack.c.h.bf16 %v357_v62 }
  0x35   : > { %2725 = vmatprep.subr.bf16.mxu0 %v3540_v38  ;;  %v563_v9 = vrot.slane %v410_v63, 1  ;;  %v773_v10 = vrot.slane %v410_v63, 2  ;;  %v759_v13 = vsel %vm729_vm1, %v756_v50, %v758_v58  ;;  %v413_v16 = vunpack.c.l.bf16 %v359_v3  ;;  %457 = vst.msk [vmem:[#allocation2 + $0x90] sm:$0xff] %vm438_vm2, %v411_v11 }
  0x36   : > { %2954 = vrot.lane.b32.xlu0 %v3843_v60, %s3642_s21  ;;  %v772_v14 = vsel %vm729_vm1, %v770_v2, %v771_v7  ;;  %v3984_v20 = vpack.i.bf16 %v412_v12, %v411_v11  ;;  %458 = vst.msk [vmem:[#allocation2 + $0x98] sm:$0xff] %vm438_vm2, %v412_v12  ;;  %v565_v21 = vrot.slane %v411_v11, 1  ;;  %v566_v23 = vrot.slane %v412_v12, 1 }
  0x37   : > { %2959 = vrot.lane.b32.xlu1 %v3888_v19, %s3642_s21  ;;  %v564_v17 = vsel %vm519_vm0, %v561_v6, %v563_v9  ;;  %v774_v18 = vsel %vm729_vm1, %v771_v7, %v773_v10  ;;  %v568_v15 = vrot.slane %v413_v16, 1  ;;  %v775_v24 = vrot.slane %v411_v11, 2 }
  0x38   : > { %2726 = vmatpush3.bf16.msra.mxu0 %v3540_v38  ;;  %v567_v25 = vsel %vm519_vm0, %v565_v21, %v566_v23  ;;  %v776_v28 = vrot.slane %v412_v12, 2  ;;  %v778_v29 = vrot.slane %v413_v16, 2  ;;  %v2633_v40 = vunpack.c.h.bf16 %v2650_v30 }
  0x39   : > { %2807 = vmatprep.subr.bf16.mxu0 %v3635_v0  ;;  %v569_v33 = vsel %vm519_vm0, %v566_v23, %v568_v15  ;;  %v404_v44 = vunpack.c.l.bf16 %v4001_v32  ;;  %v416_v45 = vunpack.c.l.bf16 %v362_v34  ;;  %v417_v61 = vunpack.c.l.bf16 %v363_v46 }
  0x3a   : > { %2964 = vrot.lane.b32.xlu0 %v3860_v4, %s3643_s12  ;;  %v4007_v35 = vpack.i.bf16 %v569_v33, %v567_v25  ;;  %v777_v37 = vsel %vm729_vm1, %v775_v24, %v776_v28  ;;  %v779_v38 = vsel %vm729_vm1, %v776_v28, %v778_v29  ;;  %460 = vst.msk [vmem:[#allocation2 + $0xa8] sm:$0xff] %vm438_vm2, %v2633_v40  ;;  %v781_v56 = vrot.slane %v2633_v40, 2  ;;  %v371_v33 = vld [vmem:[%s3782_s19 + $0xa4] sm:$0x1] }
  0x3b   : > { %2969 = vrot.lane.b32.xlu1 %v3843_v60, %s3637_s8  ;;  %v757_v60 = vsel %vm729_vm1, %v755_v49, %v756_v50  ;;  %v4011_v39 = vpack.i.bf16 %v779_v38, %v777_v37  ;;  %v571_v49 = vrot.slane %v2633_v40, 1  ;;  %v365_v50 = vld [vmem:[%s3782_s19 + $0x8c] sm:$0x1]  ;;  %v573_v51 = vrot.slane %v416_v45, 1  ;;  %461 = vst.msk [vmem:[#allocation2 + $0xb0] sm:$0xff] %vm438_vm2, %v417_v61 }
  0x3c   : > { %v3998_v31 = vpack.i.bf16 %v759_v13, %v757_v60  ;;  %v783_v58 = vrot.slane %v416_v45, 2  ;;  %v419_v2 = vunpack.c.l.bf16 %v365_v50  ;;  %v575_v9 = vrot.slane %v417_v61, 1 }
  0x3d   : > { %v574_v62 = vsel %vm519_vm0, %v571_v49, %v573_v51  ;;  %v785_v12 = vrot.slane %v417_v61, 2  ;;  %v425_v50 = vunpack.c.l.bf16 %v371_v33 }
  0x3e   : > { %2974 = vrot.lane.b32.xlu0 %v3915_v36, %s3643_s12  ;;  %v578_v11 = vrot.slane %v419_v2, 1  ;;  %v788_v13 = vrot.slane %v419_v2, 2  ;;  %v551_v2 = vrot.slane %v3901_v27, 1 }
  0x3f   : > { %2979 = vrot.lane.b32.xlu1 %v3888_v19, %s3637_s8 }
  0x42   : > { %2984 = vrot.lane.b32.xlu0 %v3860_v4, %s3638_s10  ;;  %v562_v4 = vsel %vm519_vm0, %v560_v1, %v561_v6  ;;  %v784_v1 = vsel %vm729_vm1, %v781_v56, %v783_v58 }
  0x43   : > { %2989 = vrot.lane.b32.xlu1 %v3915_v36, %s3638_s10  ;;  %v3990_v22 = vpack.i.bf16 %v564_v17, %v562_v4  ;;  %v2651_v4 = vld [vmem:[%s3782_s19 + $0x90] sm:$0xff]   ;;  %v368_v17 = vld [vmem:[%s3782_s19 + $0x98] sm:$0x1] }
  0x44   : > { %v2636_v25 = vunpack.c.l.bf16 %v2651_v4  ;;  %v2637_v28 = vunpack.c.h.bf16 %v2651_v4  ;;  %v422_v29 = vunpack.c.l.bf16 %v368_v17  ;;  %v760_v17 = vrot.slane %v3899_v26, 2 }
  0x46   : > { %2994 = vrot.lane.b32.xlu0 %v3868_v8, %s3636_s20  ;;  %v3992_v8 = vpack.i.bf16 %v774_v18, %v772_v14  ;;  %v369_v18 = vld [vmem:[%s3782_s19 + $0x9c] sm:$0xff]   ;;  %v4056_v34 = vpack.i.bf16 %v2637_v28, %v2636_v25  ;;  %463 = vst.msk [vmem:[#allocation2 + $0xc0] sm:$0xff] %vm438_vm2, %v2636_v25  ;;  %464 = vst.msk [vmem:[#allocation2 + $0xc8] sm:$0xff] %vm438_vm2, %v2637_v28  ;;  %v580_v37 = vrot.slane %v2636_v25, 1  ;;  %v581_v38 = vrot.slane %v2637_v28, 1 }
  0x47   : > { %2999 = vrot.lane.b32.xlu1 %v3932_v43, %s3636_s20  ;;  %v791_v45 = vrot.slane %v2637_v28, 2 }
  0x4a   : > { %3004 = vrot.lane.b32.xlu0 %v3888_v19, %s3639_s18  ;;  %v2632_v19 = vunpack.c.l.bf16 %v2650_v30  ;;  %v423_v30 = vunpack.c.l.bf16 %v369_v18 }
  0x4b   : > { %3009 = vrot.lane.b32.xlu1 %v3951_v53, %s3639_s18 }
  0x4c   : > { %v4017_v47 = vpack.i.bf16 %v2633_v40, %v2632_v19  ;;  %459 = vst.msk [vmem:[#allocation2 + $0xa0] sm:$0xff] %vm438_vm2, %v2632_v19  ;;  %v570_v48 = vrot.slane %v2632_v19, 1  ;;  %v780_v52 = vrot.slane %v2632_v19, 2  ;;  %v790_v19 = vrot.slane %v2636_v25, 2  ;;  %465 = vst.msk [vmem:[#allocation2 + $0xd0] sm:$0xff] %vm438_vm2, %v423_v30 }
  0x4d   : > { %v583_v40 = vrot.slane %v422_v29, 1  ;;  %v585_v51 = vrot.slane %v423_v30, 1  ;;  %v763_v25 = vrot.slane %v404_v44, 2 }
  0x4e   : > { %3014 = vrot.lane.b32.xlu0 %v3915_v36, %s3640_s23  ;;  %v572_v60 = vsel %vm519_vm0, %v570_v48, %v571_v49  ;;  %v418_v36 = vunpack.c.h.bf16 %v363_v46  ;;  %v782_v63 = vsel %vm729_vm1, %v780_v52, %v781_v56  ;;  %v793_v46 = vrot.slane %v422_v29, 2 }
  0x4f   : > { %3019 = vrot.lane.b32.xlu1 %v3953_v54, %s3640_s23  ;;  %v4030_v3 = vpack.i.bf16 %v574_v62, %v572_v60  ;;  %v4032_v6 = vpack.i.bf16 %v784_v1, %v782_v63  ;;  %v582_v48 = vsel %vm519_vm0, %v580_v37, %v581_v38  ;;  %v424_v49 = vunpack.c.h.bf16 %v369_v18  ;;  %v353_v37 = vld [vmem:[%s3782_s19 + $0x5c] sm:$0x1] }
  0x50   : > { %v4034_v7 = vpack.i.bf16 %v418_v36, %v417_v61  ;;  %462 = vst.msk [vmem:[#allocation2 + $0xb8] sm:$0xff] %vm438_vm2, %v418_v36  ;;  %v576_v10 = vrot.slane %v418_v36, 1  ;;  %v584_v52 = vsel %vm519_vm0, %v581_v38, %v583_v40  ;;  %v792_v56 = vsel %vm729_vm1, %v790_v19, %v791_v45 }
  0x51   : > { %v794_v58 = vsel %vm729_vm1, %v791_v45, %v793_v46  ;;  %v795_v60 = vrot.slane %v423_v30, 2  ;;  %v4069_v61 = vpack.i.bf16 %v584_v52, %v582_v48  ;;  %v4073_v62 = vpack.i.bf16 %v424_v49, %v423_v30  ;;  %466 = vst.msk [vmem:[#allocation2 + $0xd8] sm:$0xff] %vm438_vm2, %v424_v49  ;;  %v374_v30 = vld [vmem:[%s3782_s19 + $0xb0] sm:$0x1] }
  0x52   : > { %3024 = vrot.lane.b32.xlu0 %v3932_v43, %s3641_s15  ;;  %v786_v43 = vrot.slane %v418_v36, 2  ;;  %v577_v14 = vsel %vm519_vm0, %v575_v9, %v576_v10  ;;  %v579_v16 = vsel %vm519_vm0, %v576_v10, %v578_v11  ;;  %v4071_v36 = vpack.i.bf16 %v794_v58, %v792_v56 }
  0x53   : > { %3029 = vrot.lane.b32.xlu1 %v3962_v57, %s3641_s15  ;;  %v4047_v21 = vpack.i.bf16 %v579_v16, %v577_v14  ;;  %v588_v63 = vrot.slane %v425_v50, 1  ;;  %v550_v1 = vrot.slane %v3899_v26, 1  ;;  %v796_v9 = vrot.slane %v424_v49, 2 }
  0x54   : > { %v787_v23 = vsel %vm729_vm1, %v785_v12, %v786_v43  ;;  %v789_v15 = vsel %vm729_vm1, %v786_v43, %v788_v13  ;;  %v798_v10 = vrot.slane %v425_v50, 2  ;;  %v553_v11 = vrot.slane %v404_v44, 1 }
  0x55   : > { %v4053_v24 = vpack.i.bf16 %v789_v15, %v787_v23  ;;  %v797_v4 = vsel %vm729_vm1, %v795_v60, %v796_v9  ;;  %v3078_v16 = vpack.i.bf16 %v3901_v27, %v3899_v26  ;;  %v2652_v23 = vld [vmem:[%s3782_s19 + $0xa8] sm:$0xff]   ;;  %v761_v15 = vrot.slane %v3901_v27, 2 }
  0x56   : > { %3034 = vrot.lane.b32.xlu0 %v3951_v53, %s3642_s21  ;;  %v799_v14 = vsel %vm729_vm1, %v796_v9, %v798_v10  ;;  %v2640_v28 = vunpack.c.l.bf16 %v2652_v23  ;;  %v2641_v29 = vunpack.c.h.bf16 %v2652_v23  ;;  %v554_v33 = vsel %vm519_vm0, %v551_v2, %v553_v11  ;;  %v377_v11 = vld [vmem:[%s3782_s19 + $0xbc] sm:$0x1] }
  0x57   : > { %3039 = vrot.lane.b32.xlu1 %v3964_v59, %s3642_s21  ;;  %v4095_v18 = vpack.i.bf16 %v799_v14, %v797_v4  ;;  %v428_v26 = vunpack.c.l.bf16 %v374_v30  ;;  %v762_v40 = vsel %vm729_vm1, %v760_v17, %v761_v15  ;;  %v407_v45 = vunpack.c.l.bf16 %v353_v37 }
  0x58   : > { %v4107_v38 = vpack.i.bf16 %v2641_v29, %v2640_v28  ;;  %467 = vst.msk [vmem:[#allocation2 + $0xe0] sm:$0xff] %vm438_vm2, %v2640_v28  ;;  %468 = vst.msk [vmem:[#allocation2 + $0xe8] sm:$0xff] %vm438_vm2, %v2641_v29  ;;  %v590_v27 = vrot.slane %v2640_v28, 1  ;;  %v591_v32 = vrot.slane %v2641_v29, 1  ;;  %v764_v46 = vsel %vm729_vm1, %v761_v15, %v763_v25 }
  0x59   : > { %v593_v44 = vrot.slane %v428_v26, 1  ;;  %v803_v52 = vrot.slane %v428_v26, 2  ;;  %v3098_v56 = vpack.i.bf16 %v764_v46, %v762_v40  ;;  %v555_v58 = vrot.slane %v3924_v41, 1 }
  0x5a   : > { %3044 = vrot.lane.b32.xlu0 %v3953_v54, %s3643_s12  ;;  %v592_v48 = vsel %vm519_vm0, %v590_v27, %v591_v32  ;;  %v556_v60 = vrot.slane %v3926_v42, 1  ;;  %v431_v4 = vunpack.c.l.bf16 %v377_v11  ;;  %v765_v25 = vrot.slane %v3924_v41, 2 }
  0x5b   : > { %3049 = vrot.lane.b32.xlu1 %v3951_v53, %s3637_s8  ;;  %v586_v53 = vrot.slane %v424_v49, 1  ;;  %v594_v49 = vsel %vm519_vm0, %v591_v32, %v593_v44 }
  0x5c   : > { %v4118_v50 = vpack.i.bf16 %v594_v49, %v592_v48  ;;  %v598_v23 = vrot.slane %v431_v4, 1  ;;  %v808_v41 = vrot.slane %v431_v4, 2 }
  0x5d   : > { %v587_v12 = vsel %vm519_vm0, %v585_v51, %v586_v53  ;;  %v589_v43 = vsel %vm519_vm0, %v586_v53, %v588_v63  ;;  %v801_v51 = vrot.slane %v2641_v29, 2  ;;  %v558_v53 = vrot.slane %v407_v45, 1 }
  0x5e   : > { %3054 = vrot.lane.b32.xlu0 %v3998_v31, %s3643_s12  ;;  %v4086_v13 = vpack.i.bf16 %v589_v43, %v587_v12  ;;  %v557_v12 = vsel %vm519_vm0, %v555_v58, %v556_v60  ;;  %v768_v29 = vrot.slane %v407_v45, 2 }
  0x5f   : > { %3059 = vrot.lane.b32.xlu1 %v3964_v59, %s3637_s8  ;;  %v559_v43 = vsel %vm519_vm0, %v556_v60, %v558_v53 }
  0x60   : > { %v3118_v15 = vpack.i.bf16 %v559_v43, %v557_v12 }
  0x62   : > { %3064 = vrot.lane.b32.xlu0 %v3953_v54, %s3638_s10  ;;  %v552_v54 = vsel %vm519_vm0, %v550_v1, %v551_v2  ;;  %v804_v1 = vsel %vm729_vm1, %v801_v51, %v803_v52 }
  0x63   : > { %3069 = vrot.lane.b32.xlu1 %v3998_v31, %s3638_s10  ;;  %v3088_v19 = vpack.i.bf16 %v554_v33, %v552_v54 }
  0x66   : > { %3074 = vrot.lane.b32.xlu0 %v3962_v57, %s3636_s20  ;;  %v800_v57 = vrot.slane %v2640_v28, 2  ;;  %v766_v28 = vrot.slane %v3926_v42, 2 }
  0x67   : > { %3079 = vrot.lane.b32.xlu1 %v3078_v16, %s3636_s20 }
  0x68   : > { %v802_v63 = vsel %vm729_vm1, %v800_v57, %v801_v51  ;;  %v769_v37 = vsel %vm729_vm1, %v766_v28, %v768_v29 }
  0x69   : > { %v4127_v2 = vpack.i.bf16 %v804_v1, %v802_v63 }
  0x6a   : > { %3084 = vrot.lane.b32.xlu0 %v3964_v59, %s3639_s18  ;;  %v375_v59 = vld [vmem:[%s3782_s19 + $0xb4] sm:$0xff]  }
  0x6b   : > { %3089 = vrot.lane.b32.xlu1 %v3088_v19, %s3639_s18  ;;  %v429_v9 = vunpack.c.l.bf16 %v375_v59  ;;  %v430_v10 = vunpack.c.h.bf16 %v375_v59 }
  0x6d   : > { %v4136_v14 = vpack.i.bf16 %v430_v10, %v429_v9  ;;  %469 = vst.msk [vmem:[#allocation2 + $0xf0] sm:$0xff] %vm438_vm2, %v429_v9  ;;  %470 = vst.msk [vmem:[#allocation2 + $0xf8] sm:$0xff] %vm438_vm2, %v430_v10  ;;  %v596_v17 = vrot.slane %v430_v10, 1  ;;  %v805_v26 = vrot.slane %v429_v9, 2  ;;  %v806_v27 = vrot.slane %v430_v10, 2 }
  0x6e   : > { %3094 = vrot.lane.b32.xlu0 %v3998_v31, %s3640_s23  ;;  %v595_v31 = vrot.slane %v429_v9, 1 }
  0x6f   : > { %3099 = vrot.lane.b32.xlu1 %v3098_v56, %s3640_s23  ;;  %v599_v54 = vsel %vm519_vm0, %v596_v17, %v598_v23  ;;  %v807_v32 = vsel %vm729_vm1, %v805_v26, %v806_v27  ;;  %v809_v44 = vsel %vm729_vm1, %v806_v27, %v808_v41 }
  0x70   : > { %v597_v30 = vsel %vm519_vm0, %v595_v31, %v596_v17  ;;  %v4157_v40 = vpack.i.bf16 %v809_v44, %v807_v32 }
  0x71   : > { %v4147_v33 = vpack.i.bf16 %v599_v54, %v597_v30 }
  0x72   : > { %3104 = vrot.lane.b32.xlu0 %v3078_v16, %s3641_s15  ;;  %v767_v16 = vsel %vm729_vm1, %v765_v25, %v766_v28 }
  0x73   : > { %3109 = vrot.lane.b32.xlu1 %v3957_v55, %s3641_s15  ;;  %v3133_v42 = vpack.i.bf16 %v769_v37, %v767_v16 }
  0x76   : > { %3114 = vrot.lane.b32.xlu0 %v3088_v19, %s3642_s21 }
  0x77   : > { %3119 = vrot.lane.b32.xlu1 %v3118_v15, %s3642_s21 }
  0x7a   : > { %3124 = vrot.lane.b32.xlu0 %v3098_v56, %s3643_s12 }
  0x7b   : > { %3129 = vrot.lane.b32.xlu1 %v3088_v19, %s3637_s8 }
  0x7e   : > { %3134 = vrot.lane.b32.xlu0 %v3133_v42, %s3643_s12 }
  0x7f   : > { %3139 = vrot.lane.b32.xlu1 %v3118_v15, %s3637_s8 }
  0x82   : > { %3144 = vrot.lane.b32.xlu0 %v3098_v56, %s3638_s10 }
  0x83   : > { %3149 = vrot.lane.b32.xlu1 %v3133_v42, %s3638_s10 }
  0x86   : > { %3154 = vrot.lane.b32.xlu0 %v3957_v55, %s3636_s20 }
  0x87   : > { %3159 = vrot.lane.b32.xlu1 %v3974_v5, %s3636_s20 }
  0x8a   : > { %3164 = vrot.lane.b32.xlu0 %v3118_v15, %s3639_s18 }
  0x8b   : > { %3169 = vrot.lane.b32.xlu1 %v3990_v22, %s3639_s18 }
  0x8e   : > { %3174 = vrot.lane.b32.xlu0 %v3133_v42, %s3640_s23 }
  0x8f   : > { %3179 = vrot.lane.b32.xlu1 %v3992_v8, %s3640_s23 }
  0x90   : > { %v2895_v19 = vpop.permute.xlu0 %2894  ;;  %v2900_v45 = vpop.permute.xlu1 %2899 }
  0x91   : > { %v2897_v52 = vunpack.i.h.bf16 %v2895_v19  ;;  %v2896_v56 = vunpack.i.l.bf16 %v2895_v19  ;;  %v2902_v59 = vunpack.i.h.bf16 %v2900_v45  ;;  %v2901_v9 = vunpack.i.l.bf16 %v2900_v45 }
  0x92   : > { %3184 = vrot.lane.b32.xlu0 %v3974_v5, %s3641_s15 }
  0x93   : > { %3189 = vrot.lane.b32.xlu1 %v3984_v20, %s3641_s15 }
  0x94   : > { %v2905_v55 = vpop.permute.xlu0 %2904 }
  0x95   : > { %v2907_v46 = vunpack.i.h.bf16 %v2905_v55  ;;  %v2906_v48 = vunpack.i.l.bf16 %v2905_v55  ;;  %v2915_v49 = vpop.permute.xlu1 %2914 }
  0x96   : > { %v2917_v57 = vunpack.i.h.bf16 %v2915_v49  ;;  %v2916_v51 = vunpack.i.l.bf16 %v2915_v49  ;;  %3194 = vrot.lane.b32.xlu0 %v3990_v22, %s3642_s21 }
  0x97   : > { %698 = vst.msk [vmem:[#allocation2 + $0x8] sm:$0xff] %vm696_vm3, %v2907_v46  ;;  %697 = vst.msk [vmem:[#allocation2] sm:$0xff] %vm696_vm3, %v2906_v48  ;;  %3199 = vrot.lane.b32.xlu1 %v4007_v35, %s3642_s21 }
  0x98   : > { %907 = vst.msk [vmem:[#allocation2] sm:$0xff] %vm906_vm4, %v2916_v51  ;;  %908 = vst.msk [vmem:[#allocation2 + $0x8] sm:$0xff] %vm906_vm4, %v2917_v57  ;;  %v2910_v5 = vpop.permute.xlu0 %2909 }
  0x99   : > { %v2912_v58 = vunpack.i.h.bf16 %v2910_v5  ;;  %v2911_v60 = vunpack.i.l.bf16 %v2910_v5  ;;  %v2920_v53 = vpop.permute.xlu1 %2919  ;;  %1038 = vst.msk [vmem:[#allocation2] sm:$0xff] %vm1037_vm5, %v2896_v56  ;;  %1039 = vst.msk [vmem:[#allocation2 + $0x8] sm:$0xff] %vm1037_vm5, %v2897_v52 }
  0x9a   : > { %v2922_v63 = vunpack.i.h.bf16 %v2920_v53  ;;  %v2921_v1 = vunpack.i.l.bf16 %v2920_v53  ;;  %3204 = vrot.lane.b32.xlu0 %v3992_v8, %s3643_s12 }
  0x9b   : > { %700 = vst.msk [vmem:[#allocation2 + $0x18] sm:$0xff] %vm696_vm3, %v2912_v58  ;;  %699 = vst.msk [vmem:[#allocation2 + $0x10] sm:$0xff] %vm696_vm3, %v2911_v60  ;;  %3209 = vrot.lane.b32.xlu1 %v3990_v22, %s3637_s8 }
  0x9c   : > { %909 = vst.msk [vmem:[#allocation2 + $0x10] sm:$0xff] %vm906_vm4, %v2921_v1  ;;  %910 = vst.msk [vmem:[#allocation2 + $0x18] sm:$0xff] %vm906_vm4, %v2922_v63  ;;  %v2925_v10 = vpop.permute.xlu0 %2924 }
  0x9d   : > { %v2927_v11 = vunpack.i.h.bf16 %v2925_v10  ;;  %v2926_v12 = vunpack.i.l.bf16 %v2925_v10  ;;  %1040 = vst.msk [vmem:[#allocation2 + $0x10] sm:$0xff] %vm1037_vm5, %v2901_v9  ;;  %1041 = vst.msk [vmem:[#allocation2 + $0x18] sm:$0xff] %vm1037_vm5, %v2902_v59  ;;  %v2930_v43 = vpop.permute.xlu1 %2929 }
  0x9e   : > { %v2932_v4 = vunpack.i.h.bf16 %v2930_v43  ;;  %v2931_v31 = vunpack.i.l.bf16 %v2930_v43  ;;  %3214 = vrot.lane.b32.xlu0 %v4011_v39, %s3643_s12 }
  0x9f   : > { %1173 = vst.msk [vmem:[#allocation2] sm:$0xff] %vm1172_vm6, %v2926_v12  ;;  %1174 = vst.msk [vmem:[#allocation2 + $0x8] sm:$0xff] %vm1172_vm6, %v2927_v11  ;;  %3219 = vrot.lane.b32.xlu1 %v4007_v35, %s3637_s8 }
  0xa0   : > { %1175 = vst.msk [vmem:[#allocation2 + $0x10] sm:$0xff] %vm1172_vm6, %v2931_v31  ;;  %1176 = vst.msk [vmem:[#allocation2 + $0x18] sm:$0xff] %vm1172_vm6, %v2932_v4  ;;  %v2935_v22 = vpop.permute.xlu0 %2934 }
  0xa1   : > { %v2937_v17 = vunpack.i.h.bf16 %v2935_v22  ;;  %v2936_v23 = vunpack.i.l.bf16 %v2935_v22  ;;  %v2940_v15 = vpop.permute.xlu1 %2939 }
  0xa2   : > { %v2942_v25 = vunpack.i.h.bf16 %v2940_v15  ;;  %v2941_v28 = vunpack.i.l.bf16 %v2940_v15  ;;  %3224 = vrot.lane.b32.xlu0 %v3992_v8, %s3638_s10 }
  0xa3   : > { %1307 = vst.msk [vmem:[#allocation2] sm:$0xff] %vm1306_vm7, %v2936_v23  ;;  %1308 = vst.msk [vmem:[#allocation2 + $0x8] sm:$0xff] %vm1306_vm7, %v2937_v17  ;;  %3229 = vrot.lane.b32.xlu1 %v4011_v39, %s3638_s10 }
  0xa4   : > { %1309 = vst.msk [vmem:[#allocation2 + $0x10] sm:$0xff] %vm1306_vm7, %v2941_v28  ;;  %1310 = vst.msk [vmem:[#allocation2 + $0x18] sm:$0xff] %vm1306_vm7, %v2942_v25  ;;  %v2945_v29 = vpop.permute.xlu0 %2944 }
  0xa5   : > { %v2947_v30 = vunpack.i.h.bf16 %v2945_v29  ;;  %v2946_v54 = vunpack.i.l.bf16 %v2945_v29  ;;  %v2950_v16 = vpop.permute.xlu1 %2949 }
  0xa6   : > { %v2952_v37 = vunpack.i.h.bf16 %v2950_v16  ;;  %v2951_v26 = vunpack.i.l.bf16 %v2950_v16  ;;  %3234 = vrot.lane.b32.xlu0 %v3984_v20, %s3636_s20 }
  0xa7   : > { %1438 = vst.msk [vmem:[#allocation2] sm:$0xff] %vm1437_vm8, %v2946_v54  ;;  %1439 = vst.msk [vmem:[#allocation2 + $0x8] sm:$0xff] %vm1437_vm8, %v2947_v30  ;;  %3239 = vrot.lane.b32.xlu1 %v4017_v47, %s3636_s20 }
  0xa8   : > { %1440 = vst.msk [vmem:[#allocation2 + $0x10] sm:$0xff] %vm1437_vm8, %v2951_v26  ;;  %1441 = vst.msk [vmem:[#allocation2 + $0x18] sm:$0xff] %vm1437_vm8, %v2952_v37  ;;  %v2955_v8 = vpop.permute.xlu0 %2954 }
  0xa9   : > { %v2957_v27 = vunpack.i.h.bf16 %v2955_v8  ;;  %v2956_v41 = vunpack.i.l.bf16 %v2955_v8  ;;  %v2960_v42 = vpop.permute.xlu1 %2959 }
  0xaa   : > { %v2962_v32 = vunpack.i.h.bf16 %v2960_v42  ;;  %v2961_v44 = vunpack.i.l.bf16 %v2960_v42  ;;  %3244 = vrot.lane.b32.xlu0 %v4007_v35, %s3639_s18 }
  0xab   : > { %1573 = vst.msk [vmem:[#allocation2] sm:$0xff] %vm1572_vm9, %v2956_v41  ;;  %1574 = vst.msk [vmem:[#allocation2 + $0x8] sm:$0xff] %vm1572_vm9, %v2957_v27  ;;  %3249 = vrot.lane.b32.xlu1 %v4030_v3, %s3639_s18 }
  0xac   : > { %1575 = vst.msk [vmem:[#allocation2 + $0x10] sm:$0xff] %vm1572_vm9, %v2961_v44  ;;  %1576 = vst.msk [vmem:[#allocation2 + $0x18] sm:$0xff] %vm1572_vm9, %v2962_v32  ;;  %v2965_v20 = vpop.permute.xlu0 %2964 }
  0xad   : > { %v2967_v19 = vunpack.i.h.bf16 %v2965_v20  ;;  %v2966_v45 = vunpack.i.l.bf16 %v2965_v20  ;;  %v2970_v55 = vpop.permute.xlu1 %2969 }
  0xae   : > { %v2972_v46 = vunpack.i.h.bf16 %v2970_v55  ;;  %v2971_v48 = vunpack.i.l.bf16 %v2970_v55  ;;  %3254 = vrot.lane.b32.xlu0 %v4011_v39, %s3640_s23 }
  0xaf   : > { %1707 = vst.msk [vmem:[#allocation2] sm:$0xff] %vm1706_vm10, %v2966_v45  ;;  %1708 = vst.msk [vmem:[#allocation2 + $0x8] sm:$0xff] %vm1706_vm10, %v2967_v19  ;;  %3259 = vrot.lane.b32.xlu1 %v4032_v6, %s3640_s23 }
  0xb0   : > { %702 = vst.msk [vmem:[#allocation2 + $0x28] sm:$0xff] %vm696_vm3, %v2972_v46  ;;  %701 = vst.msk [vmem:[#allocation2 + $0x20] sm:$0xff] %vm696_vm3, %v2971_v48  ;;  %v2975_v35 = vpop.permute.xlu0 %2974 }
  0xb1   : > { %v2977_v49 = vunpack.i.h.bf16 %v2975_v35  ;;  %v2976_v57 = vunpack.i.l.bf16 %v2975_v35  ;;  %v2980_v51 = vpop.permute.xlu1 %2979 }
  0xb2   : > { %v2982_v52 = vunpack.i.h.bf16 %v2980_v51  ;;  %v2981_v56 = vunpack.i.l.bf16 %v2980_v51  ;;  %3264 = vrot.lane.b32.xlu0 %v4017_v47, %s3641_s15 }
  0xb3   : > { %1709 = vst.msk [vmem:[#allocation2 + $0x10] sm:$0xff] %vm1706_vm10, %v2976_v57  ;;  %1710 = vst.msk [vmem:[#allocation2 + $0x18] sm:$0xff] %vm1706_vm10, %v2977_v49  ;;  %3269 = vrot.lane.b32.xlu1 %v4034_v7, %s3641_s15 }
  0xb4   : > { %704 = vst.msk [vmem:[#allocation2 + $0x38] sm:$0xff] %vm696_vm3, %v2982_v52  ;;  %703 = vst.msk [vmem:[#allocation2 + $0x30] sm:$0xff] %vm696_vm3, %v2981_v56  ;;  %v2985_v39 = vpop.permute.xlu0 %2984 }
  0xb5   : > { %v2987_v5 = vunpack.i.h.bf16 %v2985_v39  ;;  %v2986_v58 = vunpack.i.l.bf16 %v2985_v39  ;;  %v2990_v60 = vpop.permute.xlu1 %2989 }
  0xb6   : > { %v2992_v53 = vunpack.i.h.bf16 %v2990_v60  ;;  %v2991_v63 = vunpack.i.l.bf16 %v2990_v60  ;;  %3274 = vrot.lane.b32.xlu0 %v4030_v3, %s3642_s21  ;;  %v1739_v47 = vld [vmem:[#allocation2] sm:$0xff]  ;;  %v1740_v1 = vld [vmem:[#allocation2 + $0x8] sm:$0xff] }
  0xb7   : > { %912 = vst.msk [vmem:[#allocation2 + $0x28] sm:$0xff] %vm906_vm4, %v2987_v5  ;;  %911 = vst.msk [vmem:[#allocation2 + $0x20] sm:$0xff] %vm906_vm4, %v2986_v58  ;;  %3279 = vrot.lane.b32.xlu1 %v4047_v21, %s3642_s21  ;;  %v1771_v59 = vpack.c.bf16 %v1740_v1, %v1739_v47 }
  0xb8   : > { %913 = vst.msk [vmem:[#allocation2 + $0x30] sm:$0xff] %vm906_vm4, %v2991_v63  ;;  %914 = vst.msk [vmem:[#allocation2 + $0x38] sm:$0xff] %vm906_vm4, %v2992_v53  ;;  %v2995_v9 = vpop.permute.xlu0 %2994 }
  0xb9   : > { %v2997_v10 = vunpack.i.h.bf16 %v2995_v9  ;;  %v2996_v11 = vunpack.i.l.bf16 %v2995_v9  ;;  %v3000_v12 = vpop.permute.xlu1 %2999  ;;  %2727 = vmatprep.mubr.bf16.mxu0 %v1771_v59 }
  0xba   : > { %v3002_v43 = vunpack.i.h.bf16 %v3000_v12  ;;  %v3001_v4 = vunpack.i.l.bf16 %v3000_v12  ;;  %3284 = vrot.lane.b32.xlu0 %v4032_v6, %s3643_s12  ;;  %v1741_v31 = vld [vmem:[#allocation2 + $0x10] sm:$0xff]  ;;  %v1742_v22 = vld [vmem:[#allocation2 + $0x18] sm:$0xff] }
  0xbb   : > { %1042 = vst.msk [vmem:[#allocation2 + $0x20] sm:$0xff] %vm1037_vm5, %v2996_v11  ;;  %1043 = vst.msk [vmem:[#allocation2 + $0x28] sm:$0xff] %vm1037_vm5, %v2997_v10  ;;  %3289 = vrot.lane.b32.xlu1 %v4030_v3, %s3637_s8  ;;  %v1772_v17 = vpack.c.bf16 %v1742_v22, %v1741_v31 }
  0xbc   : > { %1044 = vst.msk [vmem:[#allocation2 + $0x30] sm:$0xff] %vm1037_vm5, %v3001_v4  ;;  %1045 = vst.msk [vmem:[#allocation2 + $0x38] sm:$0xff] %vm1037_vm5, %v3002_v43  ;;  %v3005_v23 = vpop.permute.xlu0 %3004 }
  0xbd   : > { %v3007_v15 = vunpack.i.h.bf16 %v3005_v23  ;;  %v3006_v25 = vunpack.i.l.bf16 %v3005_v23  ;;  %v3010_v28 = vpop.permute.xlu1 %3009  ;;  %2728 = vmatmul.mubr.bf16.vlgmr.msra.gmra.mxu0 %v1772_v17 }
  0xbe   : > { %v3012_v29 = vunpack.i.h.bf16 %v3010_v28  ;;  %v3011_v30 = vunpack.i.l.bf16 %v3010_v28  ;;  %3294 = vrot.lane.b32.xlu0 %v4053_v24, %s3643_s12 }
  0xbf   : > { %1177 = vst.msk [vmem:[#allocation2 + $0x20] sm:$0xff] %vm1172_vm6, %v3006_v25  ;;  %1178 = vst.msk [vmem:[#allocation2 + $0x28] sm:$0xff] %vm1172_vm6, %v3007_v15  ;;  %3299 = vrot.lane.b32.xlu1 %v4047_v21, %s3637_s8 }
  0xc0   : > { %1179 = vst.msk [vmem:[#allocation2 + $0x30] sm:$0xff] %vm1172_vm6, %v3011_v30  ;;  %1180 = vst.msk [vmem:[#allocation2 + $0x38] sm:$0xff] %vm1172_vm6, %v3012_v29  ;;  %v3015_v3 = vpop.permute.xlu0 %3014 }
  0xc1   : > { %v3017_v54 = vunpack.i.h.bf16 %v3015_v3  ;;  %v3016_v16 = vunpack.i.l.bf16 %v3015_v3  ;;  %v3020_v37 = vpop.permute.xlu1 %3019 }
  0xc2   : > { %v3022_v26 = vunpack.i.h.bf16 %v3020_v37  ;;  %v3021_v8 = vunpack.i.l.bf16 %v3020_v37  ;;  %3304 = vrot.lane.b32.xlu0 %v4032_v6, %s3638_s10 }
  0xc3   : > { %1311 = vst.msk [vmem:[#allocation2 + $0x20] sm:$0xff] %vm1306_vm7, %v3016_v16  ;;  %1312 = vst.msk [vmem:[#allocation2 + $0x28] sm:$0xff] %vm1306_vm7, %v3017_v54  ;;  %3309 = vrot.lane.b32.xlu1 %v4053_v24, %s3638_s10 }
  0xc4   : > { %1313 = vst.msk [vmem:[#allocation2 + $0x30] sm:$0xff] %vm1306_vm7, %v3021_v8  ;;  %1314 = vst.msk [vmem:[#allocation2 + $0x38] sm:$0xff] %vm1306_vm7, %v3022_v26  ;;  %v3025_v27 = vpop.permute.xlu0 %3024 }
  0xc5   : > { %v3027_v41 = vunpack.i.h.bf16 %v3025_v27  ;;  %v3026_v42 = vunpack.i.l.bf16 %v3025_v27  ;;  %v3030_v32 = vpop.permute.xlu1 %3029 }
  0xc6   : > { %v3032_v44 = vunpack.i.h.bf16 %v3030_v32  ;;  %v3031_v20 = vunpack.i.l.bf16 %v3030_v32  ;;  %3314 = vrot.lane.b32.xlu0 %v4034_v7, %s3636_s20 }
  0xc7   : > { %1442 = vst.msk [vmem:[#allocation2 + $0x20] sm:$0xff] %vm1437_vm8, %v3026_v42  ;;  %1443 = vst.msk [vmem:[#allocation2 + $0x28] sm:$0xff] %vm1437_vm8, %v3027_v41  ;;  %3319 = vrot.lane.b32.xlu1 %v4056_v34, %s3636_s20 }
  0xc8   : > { %1444 = vst.msk [vmem:[#allocation2 + $0x30] sm:$0xff] %vm1437_vm8, %v3031_v20  ;;  %1445 = vst.msk [vmem:[#allocation2 + $0x38] sm:$0xff] %vm1437_vm8, %v3032_v44  ;;  %v3035_v6 = vpop.permute.xlu0 %3034 }
  0xc9   : > { %v3037_v19 = vunpack.i.h.bf16 %v3035_v6  ;;  %v3036_v45 = vunpack.i.l.bf16 %v3035_v6  ;;  %v3040_v55 = vpop.permute.xlu1 %3039 }
  0xca   : > { %v3042_v46 = vunpack.i.h.bf16 %v3040_v55  ;;  %v3041_v48 = vunpack.i.l.bf16 %v3040_v55  ;;  %3324 = vrot.lane.b32.xlu0 %v4047_v21, %s3639_s18 }
  0xcb   : > { %1577 = vst.msk [vmem:[#allocation2 + $0x20] sm:$0xff] %vm1572_vm9, %v3036_v45  ;;  %1578 = vst.msk [vmem:[#allocation2 + $0x28] sm:$0xff] %vm1572_vm9, %v3037_v19  ;;  %3329 = vrot.lane.b32.xlu1 %v4069_v61, %s3639_s18 }
  0xcc   : > { %1579 = vst.msk [vmem:[#allocation2 + $0x30] sm:$0xff] %vm1572_vm9, %v3041_v48  ;;  %1580 = vst.msk [vmem:[#allocation2 + $0x38] sm:$0xff] %vm1572_vm9, %v3042_v46  ;;  %v3045_v7 = vpop.permute.xlu0 %3044  ;;  %v3541_v46 = vld [vmem:[%s4777_s3 + $0x38] sm:$0xff]  }
  0xcd   : > { %v3047_v35 = vunpack.i.h.bf16 %v3045_v7  ;;  %v3046_v49 = vunpack.i.l.bf16 %v3045_v7  ;;  %v3050_v57 = vpop.permute.xlu1 %3049  ;;  %2759 = vmatprep.subr.bf16.mxu1 %v3541_v46 }
  0xce   : > { %v3052_v51 = vunpack.i.h.bf16 %v3050_v57  ;;  %v3051_v52 = vunpack.i.l.bf16 %v3050_v57  ;;  %3334 = vrot.lane.b32.xlu0 %v4053_v24, %s3640_s23  ;;  %2760 = vmatpush3.bf16.msra.mxu1 %v3541_v46 }
  0xcf   : > { %1711 = vst.msk [vmem:[#allocation2 + $0x20] sm:$0xff] %vm1706_vm10, %v3046_v49  ;;  %1712 = vst.msk [vmem:[#allocation2 + $0x28] sm:$0xff] %vm1706_vm10, %v3047_v35  ;;  %3339 = vrot.lane.b32.xlu1 %v4071_v36, %s3640_s23 }
  0xd0   : > { %706 = vst.msk [vmem:[#allocation2 + $0x48] sm:$0xff] %vm696_vm3, %v3052_v51  ;;  %705 = vst.msk [vmem:[#allocation2 + $0x40] sm:$0xff] %vm696_vm3, %v3051_v52  ;;  %v3055_v21 = vpop.permute.xlu0 %3054 }
  0xd1   : > { %v3057_v56 = vunpack.i.h.bf16 %v3055_v21  ;;  %v3056_v39 = vunpack.i.l.bf16 %v3055_v21  ;;  %v3060_v5 = vpop.permute.xlu1 %3059 }
  0xd2   : > { %v3062_v58 = vunpack.i.h.bf16 %v3060_v5  ;;  %v3061_v60 = vunpack.i.l.bf16 %v3060_v5  ;;  %3344 = vrot.lane.b32.xlu0 %v4056_v34, %s3641_s15 }
  0xd3   : > { %1714 = vst.msk [vmem:[#allocation2 + $0x38] sm:$0xff] %vm1706_vm10, %v3057_v56  ;;  %1713 = vst.msk [vmem:[#allocation2 + $0x30] sm:$0xff] %vm1706_vm10, %v3056_v39  ;;  %3349 = vrot.lane.b32.xlu1 %v4073_v62, %s3641_s15 }
  0xd4   : > { %708 = vst.msk [vmem:[#allocation2 + $0x58] sm:$0xff] %vm696_vm3, %v3062_v58  ;;  %707 = vst.msk [vmem:[#allocation2 + $0x50] sm:$0xff] %vm696_vm3, %v3061_v60  ;;  %v3065_v24 = vpop.permute.xlu0 %3064 }
  0xd5   : > { %v3067_v53 = vunpack.i.h.bf16 %v3065_v24  ;;  %v3066_v63 = vunpack.i.l.bf16 %v3065_v24  ;;  %v3070_v47 = vpop.permute.xlu1 %3069 }
  0xd6   : > { %v3072_v1 = vunpack.i.h.bf16 %v3070_v47  ;;  %v3071_v59 = vunpack.i.l.bf16 %v3070_v47  ;;  %3354 = vrot.lane.b32.xlu0 %v4069_v61, %s3642_s21  ;;  %v1743_v34 = vld [vmem:[#allocation2 + $0x20] sm:$0xff]  ;;  %v1744_v9 = vld [vmem:[#allocation2 + $0x28] sm:$0xff] }
  0xd7   : > { %916 = vst.msk [vmem:[#allocation2 + $0x48] sm:$0xff] %vm906_vm4, %v3067_v53  ;;  %915 = vst.msk [vmem:[#allocation2 + $0x40] sm:$0xff] %vm906_vm4, %v3066_v63  ;;  %3359 = vrot.lane.b32.xlu1 %v4086_v13, %s3642_s21  ;;  %v1773_v10 = vpack.c.bf16 %v1744_v9, %v1743_v34 }
  0xd8   : > { %917 = vst.msk [vmem:[#allocation2 + $0x50] sm:$0xff] %vm906_vm4, %v3071_v59  ;;  %918 = vst.msk [vmem:[#allocation2 + $0x58] sm:$0xff] %vm906_vm4, %v3072_v1  ;;  %v3075_v11 = vpop.permute.xlu0 %3074 }
  0xd9   : > { %v3077_v12 = vunpack.i.h.bf16 %v3075_v11  ;;  %v3076_v43 = vunpack.i.l.bf16 %v3075_v11  ;;  %v3080_v4 = vpop.permute.xlu1 %3079  ;;  %2731 = vmatprep.mubr.bf16.mxu0 %v1773_v10 }
  0xda   : > { %v3082_v31 = vunpack.i.h.bf16 %v3080_v4  ;;  %v3081_v22 = vunpack.i.l.bf16 %v3080_v4  ;;  %3364 = vrot.lane.b32.xlu0 %v4071_v36, %s3643_s12  ;;  %v1745_v17 = vld [vmem:[#allocation2 + $0x30] sm:$0xff]  ;;  %v1746_v23 = vld [vmem:[#allocation2 + $0x38] sm:$0xff] }
  0xdb   : > { %1046 = vst.msk [vmem:[#allocation2 + $0x40] sm:$0xff] %vm1037_vm5, %v3076_v43  ;;  %1047 = vst.msk [vmem:[#allocation2 + $0x48] sm:$0xff] %vm1037_vm5, %v3077_v12  ;;  %3369 = vrot.lane.b32.xlu1 %v4069_v61, %s3637_s8  ;;  %v1774_v15 = vpack.c.bf16 %v1746_v23, %v1745_v17  ;;  %v2653_v12 = vld [vmem:[%s3782_s19 + $0xc0] sm:$0xff]   ;;  %v3545_v17 = vld [vmem:[%s4777_s3 + $0x18] sm:$0xff]  }
  0xdc   : > { %1048 = vst.msk [vmem:[#allocation2 + $0x50] sm:$0xff] %vm1037_vm5, %v3081_v22  ;;  %1049 = vst.msk [vmem:[#allocation2 + $0x58] sm:$0xff] %vm1037_vm5, %v3082_v31  ;;  %v3085_v25 = vpop.permute.xlu0 %3084  ;;  %v380_v22 = vld [vmem:[%s3782_s19 + $0xc8] sm:$0x1] }
  0xdd   : > { %v3087_v28 = vunpack.i.h.bf16 %v3085_v25  ;;  %v3086_v29 = vunpack.i.l.bf16 %v3085_v25  ;;  %v3090_v30 = vpop.permute.xlu1 %3089  ;;  %2732 = vmatmul.mubr.bf16.gmra.mxu0 %v1774_v15 }
  0xde   : > { %v3092_v3 = vunpack.i.h.bf16 %v3090_v30  ;;  %v3091_v54 = vunpack.i.l.bf16 %v3090_v30  ;;  %3374 = vrot.lane.b32.xlu0 %v4095_v18, %s3643_s12  ;;  %v4404_v30 = vunpack.c.l.bf16 %v2653_v12 }
  0xdf   : > { %1181 = vst.msk [vmem:[#allocation2 + $0x40] sm:$0xff] %vm1172_vm6, %v3086_v29  ;;  %1182 = vst.msk [vmem:[#allocation2 + $0x48] sm:$0xff] %vm1172_vm6, %v3087_v28  ;;  %3379 = vrot.lane.b32.xlu1 %v4086_v13, %s3637_s8 }
  0xe0   : > { %1183 = vst.msk [vmem:[#allocation2 + $0x50] sm:$0xff] %vm1172_vm6, %v3091_v54  ;;  %1184 = vst.msk [vmem:[#allocation2 + $0x58] sm:$0xff] %vm1172_vm6, %v3092_v3  ;;  %v3095_v61 = vpop.permute.xlu0 %3094  ;;  %v4406_v3 = vunpack.c.h.bf16 %v2653_v12 }
  0xe1   : > { %v3097_v16 = vunpack.i.h.bf16 %v3095_v61  ;;  %v3096_v37 = vunpack.i.l.bf16 %v3095_v61  ;;  %v3100_v26 = vpop.permute.xlu1 %3099  ;;  %v434_v61 = vunpack.c.l.bf16 %v380_v22 }
  0xe2   : > { %v3102_v8 = vunpack.i.h.bf16 %v3100_v26  ;;  %v3101_v27 = vunpack.i.l.bf16 %v3100_v26  ;;  %3384 = vrot.lane.b32.xlu0 %v4071_v36, %s3638_s10  ;;  %v4434_v46 = vpack.i.bf16 %v4406_v3, %v4404_v30 }
  0xe3   : > { %1315 = vst.msk [vmem:[#allocation2 + $0x40] sm:$0xff] %vm1306_vm7, %v3096_v37  ;;  %1316 = vst.msk [vmem:[#allocation2 + $0x48] sm:$0xff] %vm1306_vm7, %v3097_v16  ;;  %3389 = vrot.lane.b32.xlu1 %v4095_v18, %s3638_s10 }
  0xe4   : > { %1317 = vst.msk [vmem:[#allocation2 + $0x50] sm:$0xff] %vm1306_vm7, %v3101_v27  ;;  %1318 = vst.msk [vmem:[#allocation2 + $0x58] sm:$0xff] %vm1306_vm7, %v3102_v8  ;;  %v3105_v41 = vpop.permute.xlu0 %3104 }
  0xe5   : > { %v3107_v42 = vunpack.i.h.bf16 %v3105_v41  ;;  %v3106_v32 = vunpack.i.l.bf16 %v3105_v41  ;;  %v3110_v44 = vpop.permute.xlu1 %3109  ;;  %v1071_v41 = vrot.slane %v4404_v30, 1 }
  0xe6   : > { %v3112_v20 = vunpack.i.h.bf16 %v3110_v44  ;;  %v3111_v6 = vunpack.i.l.bf16 %v3110_v44  ;;  %3394 = vrot.lane.b32.xlu0 %v4073_v62, %s3636_s20  ;;  %v1074_v44 = vrot.slane %v434_v61, 1 }
  0xe7   : > { %1446 = vst.msk [vmem:[#allocation2 + $0x40] sm:$0xff] %vm1437_vm8, %v3106_v32  ;;  %1447 = vst.msk [vmem:[#allocation2 + $0x48] sm:$0xff] %vm1437_vm8, %v3107_v42  ;;  %3399 = vrot.lane.b32.xlu1 %v4107_v38, %s3636_s20  ;;  %v1072_v42 = vrot.slane %v4406_v3, 1 }
  0xe8   : > { %1448 = vst.msk [vmem:[#allocation2 + $0x50] sm:$0xff] %vm1437_vm8, %v3111_v6  ;;  %1449 = vst.msk [vmem:[#allocation2 + $0x58] sm:$0xff] %vm1437_vm8, %v3112_v20  ;;  %v3115_v36 = vpop.permute.xlu0 %3114 }
  0xe9   : > { %v3117_v19 = vunpack.i.h.bf16 %v3115_v36  ;;  %v3116_v45 = vunpack.i.l.bf16 %v3115_v36  ;;  %v3120_v55 = vpop.permute.xlu1 %3119 }
  0xea   : > { %v3122_v62 = vunpack.i.h.bf16 %v3120_v55  ;;  %v3121_v48 = vunpack.i.l.bf16 %v3120_v55  ;;  %3404 = vrot.lane.b32.xlu0 %v4086_v13, %s3639_s18  ;;  %v3542_v13 = vld [vmem:[%s4777_s3 + $0x30] sm:$0xff]  }
  0xeb   : > { %1581 = vst.msk [vmem:[#allocation2 + $0x40] sm:$0xff] %vm1572_vm9, %v3116_v45  ;;  %1582 = vst.msk [vmem:[#allocation2 + $0x48] sm:$0xff] %vm1572_vm9, %v3117_v19  ;;  %3409 = vrot.lane.b32.xlu1 %v4118_v50, %s3639_s18  ;;  %2761 = vmatprep.subr.bf16.mxu1 %v3542_v13  ;;  %v3547_v19 = vld [vmem:[%s4777_s3 + $0x8] sm:$0xff]  }
  0xec   : > { %1583 = vst.msk [vmem:[#allocation2 + $0x50] sm:$0xff] %vm1572_vm9, %v3121_v48  ;;  %1584 = vst.msk [vmem:[#allocation2 + $0x58] sm:$0xff] %vm1572_vm9, %v3122_v62  ;;  %v3125_v7 = vpop.permute.xlu0 %3124  ;;  %2762 = vmatpush3.bf16.msra.mxu1 %v3542_v13  ;;  %v1073_v62 = vsel %vm519_vm0, %v1071_v41, %v1072_v42  ;;  %v1075_v48 = vsel %vm519_vm0, %v1072_v42, %v1074_v44 }
  0xed   : > { %v3127_v35 = vunpack.i.h.bf16 %v3125_v7  ;;  %v3126_v49 = vunpack.i.l.bf16 %v3125_v7  ;;  %v3130_v57 = vpop.permute.xlu1 %3129  ;;  %v1205_v7 = vrot.slane %v4404_v30, 2 }
  0xee   : > { %v3132_v51 = vunpack.i.h.bf16 %v3130_v57  ;;  %v3131_v52 = vunpack.i.l.bf16 %v3130_v57  ;;  %3414 = vrot.lane.b32.xlu0 %v4095_v18, %s3640_s23  ;;  %v3543_v18 = vld [vmem:[%s4777_s3 + $0x28] sm:$0xff]  }
  0xef   : > { %1715 = vst.msk [vmem:[#allocation2 + $0x40] sm:$0xff] %vm1706_vm10, %v3126_v49  ;;  %1716 = vst.msk [vmem:[#allocation2 + $0x48] sm:$0xff] %vm1706_vm10, %v3127_v35  ;;  %3419 = vrot.lane.b32.xlu1 %v4127_v2, %s3640_s23  ;;  %2763 = vmatprep.subr.bf16.mxu1 %v3543_v18  ;;  %v1206_v35 = vrot.slane %v4406_v3, 2  ;;  %v1208_v49 = vrot.slane %v434_v61, 2  ;;  %v381_v57 = vld [vmem:[%s3782_s19 + $0xcc] sm:$0xff]  }
  0xf0   : > { %710 = vst.msk [vmem:[#allocation2 + $0x68] sm:$0xff] %vm696_vm3, %v3132_v51  ;;  %709 = vst.msk [vmem:[#allocation2 + $0x60] sm:$0xff] %vm696_vm3, %v3131_v52  ;;  %v3135_v21 = vpop.permute.xlu0 %3134  ;;  %2764 = vmatpush3.bf16.msra.mxu1 %v3543_v18  ;;  %v4453_v18 = vpack.i.bf16 %v1075_v48, %v1073_v62 }
  0xf1   : > { %v3137_v56 = vunpack.i.h.bf16 %v3135_v21  ;;  %v3136_v39 = vunpack.i.l.bf16 %v3135_v21  ;;  %v3140_v5 = vpop.permute.xlu1 %3139  ;;  %v383_v21 = vld [vmem:[%s3782_s19 + $0xd4] sm:$0x1] }
  0xf2   : > { %v3142_v58 = vunpack.i.h.bf16 %v3140_v5  ;;  %v3141_v60 = vunpack.i.l.bf16 %v3140_v5  ;;  %3424 = vrot.lane.b32.xlu0 %v4107_v38, %s3641_s15  ;;  %v3544_v38 = vld [vmem:[%s4777_s3 + $0x20] sm:$0xff]  }
  0xf3   : > { %1718 = vst.msk [vmem:[#allocation2 + $0x58] sm:$0xff] %vm1706_vm10, %v3137_v56  ;;  %1717 = vst.msk [vmem:[#allocation2 + $0x50] sm:$0xff] %vm1706_vm10, %v3136_v39  ;;  %3429 = vrot.lane.b32.xlu1 %v4136_v14, %s3641_s15  ;;  %2765 = vmatprep.subr.bf16.mxu1 %v3544_v38  ;;  %v3548_v56 = vld [vmem:[%s4777_s3] sm:$0xff]  }
  0xf4   : > { %712 = vst.msk [vmem:[#allocation2 + $0x78] sm:$0xff] %vm696_vm3, %v3142_v58  ;;  %711 = vst.msk [vmem:[#allocation2 + $0x70] sm:$0xff] %vm696_vm3, %v3141_v60  ;;  %v3145_v24 = vpop.permute.xlu0 %3144  ;;  %2766 = vmatpush3.bf16.msra.mxu1 %v3544_v38  ;;  %v435_v58 = vunpack.c.l.bf16 %v381_v57  ;;  %v436_v60 = vunpack.c.h.bf16 %v381_v57 }
  0xf5   : > { %v3147_v53 = vunpack.i.h.bf16 %v3145_v24  ;;  %v3146_v63 = vunpack.i.l.bf16 %v3145_v24  ;;  %v3150_v47 = vpop.permute.xlu1 %3149  ;;  %2767 = vmatprep.subr.bf16.mxu1 %v3545_v17 }
  0xf6   : > { %v3152_v1 = vunpack.i.h.bf16 %v3150_v47  ;;  %v3151_v59 = vunpack.i.l.bf16 %v3150_v47  ;;  %3434 = vrot.lane.b32.xlu0 %v4118_v50, %s3642_s21  ;;  %v1747_v34 = vld [vmem:[#allocation2 + $0x40] sm:$0xff]  ;;  %v1748_v9 = vld [vmem:[#allocation2 + $0x48] sm:$0xff]  ;;  %v1606_v30 = vrot.slane %v436_v60, 2 }
  0xf7   : > { %920 = vst.msk [vmem:[#allocation2 + $0x68] sm:$0xff] %vm906_vm4, %v3147_v53  ;;  %919 = vst.msk [vmem:[#allocation2 + $0x60] sm:$0xff] %vm906_vm4, %v3146_v63  ;;  %3439 = vrot.lane.b32.xlu1 %v4147_v33, %s3642_s21  ;;  %v1775_v10 = vpack.c.bf16 %v1748_v9, %v1747_v34  ;;  %v1207_v53 = vsel %vm729_vm1, %v1205_v7, %v1206_v35  ;;  %v437_v63 = vunpack.c.l.bf16 %v383_v21 }
  0xf8   : > { %921 = vst.msk [vmem:[#allocation2 + $0x70] sm:$0xff] %vm906_vm4, %v3151_v59  ;;  %922 = vst.msk [vmem:[#allocation2 + $0x78] sm:$0xff] %vm906_vm4, %v3152_v1  ;;  %v3155_v11 = vpop.permute.xlu0 %3154  ;;  %2768 = vmatpush3.bf16.msra.mxu1 %v3545_v17 }
  0xf9   : > { %v3157_v43 = vunpack.i.h.bf16 %v3155_v11  ;;  %v3156_v4 = vunpack.i.l.bf16 %v3155_v11  ;;  %v3160_v31 = vpop.permute.xlu1 %3159  ;;  %2735 = vmatprep.mubr.bf16.mxu0 %v1775_v10  ;;  %v1471_v10 = vrot.slane %v435_v58, 1  ;;  %v1472_v11 = vrot.slane %v436_v60, 1 }
  0xfa   : > { %v3162_v23 = vunpack.i.h.bf16 %v3160_v31  ;;  %v3161_v15 = vunpack.i.l.bf16 %v3160_v31  ;;  %3444 = vrot.lane.b32.xlu0 %v4127_v2, %s3643_s12  ;;  %v1749_v25 = vld [vmem:[#allocation2 + $0x50] sm:$0xff]  ;;  %v1750_v28 = vld [vmem:[#allocation2 + $0x58] sm:$0xff]  ;;  %v1608_v3 = vrot.slane %v437_v63, 2 }
  0xfb   : > { %1050 = vst.msk [vmem:[#allocation2 + $0x60] sm:$0xff] %vm1037_vm5, %v3156_v4  ;;  %1051 = vst.msk [vmem:[#allocation2 + $0x68] sm:$0xff] %vm1037_vm5, %v3157_v43  ;;  %3449 = vrot.lane.b32.xlu1 %v4118_v50, %s3637_s8  ;;  %v1776_v29 = vpack.c.bf16 %v1750_v28, %v1749_v25  ;;  %v3546_v50 = vld [vmem:[%s4777_s3 + $0x10] sm:$0xff]   ;;  %v1474_v43 = vrot.slane %v437_v63, 1 }
  0xfc   : > { %1052 = vst.msk [vmem:[#allocation2 + $0x70] sm:$0xff] %vm1037_vm5, %v3161_v15  ;;  %1053 = vst.msk [vmem:[#allocation2 + $0x78] sm:$0xff] %vm1037_vm5, %v3162_v23  ;;  %v3165_v54 = vpop.permute.xlu0 %3164  ;;  %2769 = vmatprep.subr.bf16.mxu1 %v3546_v50  ;;  %v3508_v23 = vpack.i.bf16 %v436_v60, %v435_v58  ;;  %v1473_v15 = vsel %vm519_vm0, %v1471_v10, %v1472_v11 }
  0xfd   : > { %v3167_v16 = vunpack.i.h.bf16 %v3165_v54  ;;  %v3166_v37 = vunpack.i.l.bf16 %v3165_v54  ;;  %v3170_v26 = vpop.permute.xlu1 %3169  ;;  %2736 = vmatmul.mubr.bf16.gmra.mxu0 %v1776_v29  ;;  %2770 = vmatpush3.bf16.msra.mxu1 %v3546_v50  ;;  %v1475_v28 = vsel %vm519_vm0, %v1472_v11, %v1474_v43  ;;  %v1605_v29 = vrot.slane %v435_v58, 2 }
  0xfe   : > { %v3172_v8 = vunpack.i.h.bf16 %v3170_v26  ;;  %v3171_v27 = vunpack.i.l.bf16 %v3170_v26  ;;  %3454 = vrot.lane.b32.xlu0 %v4157_v40, %s3643_s12  ;;  %2771 = vmatprep.subr.bf16.mxu1 %v3547_v19  ;;  %v3518_v26 = vpack.i.bf16 %v1475_v28, %v1473_v15 }
  0xff   : > { %1185 = vst.msk [vmem:[#allocation2 + $0x60] sm:$0xff] %vm1172_vm6, %v3166_v37  ;;  %1186 = vst.msk [vmem:[#allocation2 + $0x68] sm:$0xff] %vm1172_vm6, %v3167_v16  ;;  %3459 = vrot.lane.b32.xlu1 %v4147_v33, %s3637_s8  ;;  %s282_s8 = scalar_lea.vmem [#allocation4], %s281_s22 }
 0x100   : > { %1187 = vst.msk [vmem:[#allocation2 + $0x70] sm:$0xff] %vm1172_vm6, %v3171_v27  ;;  %1188 = vst.msk [vmem:[#allocation2 + $0x78] sm:$0xff] %vm1172_vm6, %v3172_v8  ;;  %v3175_v32 = vpop.permute.xlu0 %3174  ;;  %v1607_v8 = vsel %vm729_vm1, %v1605_v29, %v1606_v30  ;;  %v1609_v27 = vsel %vm729_vm1, %v1606_v30, %v1608_v3 }
 0x101   : > { %v3177_v20 = vunpack.i.h.bf16 %v3175_v32  ;;  %v3176_v6 = vunpack.i.l.bf16 %v3175_v32  ;;  %v3180_v36 = vpop.permute.xlu1 %3179  ;;  %2772 = vmatpush3.bf16.msra.mxu1 %v3547_v19 }
 0x102   : > { %v3182_v45 = vunpack.i.h.bf16 %v3180_v36  ;;  %v3181_v55 = vunpack.i.l.bf16 %v3180_v36  ;;  %3464 = vrot.lane.b32.xlu0 %v4127_v2, %s3638_s10  ;;  %2773 = vmatprep.subr.bf16.mxu1 %v3548_v56 }
 0x103   : > { %1319 = vst.msk [vmem:[#allocation2 + $0x60] sm:$0xff] %vm1306_vm7, %v3176_v6  ;;  %1320 = vst.msk [vmem:[#allocation2 + $0x68] sm:$0xff] %vm1306_vm7, %v3177_v20  ;;  %3469 = vrot.lane.b32.xlu1 %v4157_v40, %s3638_s10  ;;  %s2509_s10 = sshll.u32 %s282_s8, 4  ;;  %s4730_s10 = int_to_ptr.vmem [resolvable:$true] %s2509_s10 }
 0x104   : > { %1321 = vst.msk [vmem:[#allocation2 + $0x70] sm:$0xff] %vm1306_vm7, %v3181_v55  ;;  %1322 = vst.msk [vmem:[#allocation2 + $0x78] sm:$0xff] %vm1306_vm7, %v3182_v45  ;;  %v3185_v2 = vpop.permute.xlu0 %3184  ;;  %v3528_v45 = vpack.i.bf16 %v1609_v27, %v1607_v8 }
 0x105   : > { %v3187_v13 = vunpack.i.h.bf16 %v3185_v2  ;;  %v3186_v51 = vunpack.i.l.bf16 %v3185_v2  ;;  %v3190_v52 = vpop.permute.xlu1 %3189  ;;  %2774 = vmatpush3.bf16.msra.mxu1 %v3548_v56 }
 0x106   : > { %v3192_v39 = vunpack.i.h.bf16 %v3190_v52  ;;  %v3191_v5 = vunpack.i.l.bf16 %v3190_v52  ;;  %3474 = vrot.lane.b32.xlu0 %v4136_v14, %s3636_s20  ;;  %v1209_v14 = vsel %vm729_vm1, %v1206_v35, %v1208_v49 }
 0x107   : > { %1450 = vst.msk [vmem:[#allocation2 + $0x60] sm:$0xff] %vm1437_vm8, %v3186_v51  ;;  %1451 = vst.msk [vmem:[#allocation2 + $0x68] sm:$0xff] %vm1437_vm8, %v3187_v13  ;;  %3479 = vrot.lane.b32.xlu1 %v4434_v46, %s3636_s20  ;;  %v3498_v9 = vpack.i.bf16 %v1209_v14, %v1207_v53 }
 0x108   : > { %1452 = vst.msk [vmem:[#allocation2 + $0x70] sm:$0xff] %vm1437_vm8, %v3191_v5  ;;  %1453 = vst.msk [vmem:[#allocation2 + $0x78] sm:$0xff] %vm1437_vm8, %v3192_v39  ;;  %v3195_v24 = vpop.permute.xlu0 %3194 }
 0x109   : > { %v3197_v47 = vunpack.i.h.bf16 %v3195_v24  ;;  %v3196_v38 = vunpack.i.l.bf16 %v3195_v24  ;;  %v3200_v1 = vpop.permute.xlu1 %3199 }
 0x10a   : > { %v3202_v59 = vunpack.i.h.bf16 %v3200_v1  ;;  %v3201_v34 = vunpack.i.l.bf16 %v3200_v1  ;;  %3484 = vrot.lane.b32.xlu0 %v4147_v33, %s3639_s18 }
 0x10b   : > { %1585 = vst.msk [vmem:[#allocation2 + $0x60] sm:$0xff] %vm1572_vm9, %v3196_v38  ;;  %1586 = vst.msk [vmem:[#allocation2 + $0x68] sm:$0xff] %vm1572_vm9, %v3197_v47  ;;  %3489 = vrot.lane.b32.xlu1 %v4453_v18, %s3639_s18  ;;  %s4728_s18 = scalar_lea.hbm %s4781_s7, %s2607_s17 }
 0x10c   : > { %1587 = vst.msk [vmem:[#allocation2 + $0x70] sm:$0xff] %vm1572_vm9, %v3201_v34  ;;  %1588 = vst.msk [vmem:[#allocation2 + $0x78] sm:$0xff] %vm1572_vm9, %v3202_v59  ;;  %v3205_v12 = vpop.permute.xlu0 %3204 }
 0x10d   : > { %v3207_v4 = vunpack.i.h.bf16 %v3205_v12  ;;  %v3206_v31 = vunpack.i.l.bf16 %v3205_v12  ;;  %v3210_v22 = vpop.permute.xlu1 %3209 }
 0x10e   : > { %v3212_v33 = vunpack.i.h.bf16 %v3210_v22  ;;  %v3211_v17 = vunpack.i.l.bf16 %v3210_v22  ;;  %3494 = vrot.lane.b32.xlu0 %v4157_v40, %s3640_s23 }
 0x10f   : > { %1719 = vst.msk [vmem:[#allocation2 + $0x60] sm:$0xff] %vm1706_vm10, %v3206_v31  ;;  %1720 = vst.msk [vmem:[#allocation2 + $0x68] sm:$0xff] %vm1706_vm10, %v3207_v4  ;;  %3499 = vrot.lane.b32.xlu1 %v3498_v9, %s3640_s23  ;;  %s2497_s23 = scalar_lea.sflag [#allocation5], %s281_s22 }
 0x110   : > { %714 = vst.msk [vmem:[#allocation2 + $0x88] sm:$0xff] %vm696_vm3, %v3212_v33  ;;  %713 = vst.msk [vmem:[#allocation2 + $0x80] sm:$0xff] %vm696_vm3, %v3211_v17  ;;  %v3215_v25 = vpop.permute.xlu0 %3214 }
 0x111   : > { %v3217_v40 = vunpack.i.h.bf16 %v3215_v25  ;;  %v3216_v54 = vunpack.i.l.bf16 %v3215_v25  ;;  %v3220_v61 = vpop.permute.xlu1 %3219 }
 0x112   : > { %v3222_v16 = vunpack.i.h.bf16 %v3220_v61  ;;  %v3221_v37 = vunpack.i.l.bf16 %v3220_v61  ;;  %3504 = vrot.lane.b32.xlu0 %v4434_v46, %s3641_s15 }
 0x113   : > { %1722 = vst.msk [vmem:[#allocation2 + $0x78] sm:$0xff] %vm1706_vm10, %v3217_v40  ;;  %1721 = vst.msk [vmem:[#allocation2 + $0x70] sm:$0xff] %vm1706_vm10, %v3216_v54  ;;  %3509 = vrot.lane.b32.xlu1 %v3508_v23, %s3641_s15  ;;  %s3557_s15 = scalar_lea.vmem %s4730_s10, 16 }
 0x114   : > { %716 = vst.msk [vmem:[#allocation2 + $0x98] sm:$0xff] %vm696_vm3, %v3222_v16  ;;  %715 = vst.msk [vmem:[#allocation2 + $0x90] sm:$0xff] %vm696_vm3, %v3221_v37  ;;  %v3225_v50 = vpop.permute.xlu0 %3224  ;;  %p3558_p12 = scmp.ne.s32.totalorder %s4730_s10, %s3557_s15 }
 0x115   : > { %v3227_v41 = vunpack.i.h.bf16 %v3225_v50  ;;  %v3226_v42 = vunpack.i.l.bf16 %v3225_v50  ;;  %v3230_v32 = vpop.permute.xlu1 %3229 }
 0x116   : > { %v3232_v44 = vunpack.i.h.bf16 %v3230_v32  ;;  %v3231_v20 = vunpack.i.l.bf16 %v3230_v32  ;;  %3514 = vrot.lane.b32.xlu0 %v4453_v18, %s3642_s21  ;;  %v1751_v6 = vld [vmem:[#allocation2 + $0x60] sm:$0xff]  ;;  %v1752_v36 = vld [vmem:[#allocation2 + $0x68] sm:$0xff]  ;;  %p3559_p13 = pnand %p3558_p12, %p3726_p4 }
 0x117   : > { %924 = vst.msk [vmem:[#allocation2 + $0x88] sm:$0xff] %vm906_vm4, %v3227_v41  ;;  %923 = vst.msk [vmem:[#allocation2 + $0x80] sm:$0xff] %vm906_vm4, %v3226_v42  ;;  %3519 = vrot.lane.b32.xlu1 %v3518_v26, %s3642_s21  ;;  %v1777_v19 = vpack.c.bf16 %v1752_v36, %v1751_v6  ;;  %s3561_s21 = sshll.u32 %s3645_s27, 4  ;;  %s3562_s21 = int_to_ptr.vmem [resolvable:$false] %s3561_s21 }
 0x118   : > { %925 = vst.msk [vmem:[#allocation2 + $0x90] sm:$0xff] %vm906_vm4, %v3231_v20  ;;  %926 = vst.msk [vmem:[#allocation2 + $0x98] sm:$0xff] %vm906_vm4, %v3232_v44  ;;  %v3235_v55 = vpop.permute.xlu0 %3234  ;;  %p3560_p0 = pneg %p3559_p13  ;;  %p3564_p1 = scmp.lt.s32.totalorder %s4730_s10, %s3562_s21 }
 0x119   : > { %v3237_v46 = vunpack.i.h.bf16 %v3235_v55  ;;  %v3236_v62 = vunpack.i.l.bf16 %v3235_v55  ;;  %v3240_v2 = vpop.permute.xlu1 %3239  ;;  %2739 = vmatprep.mubr.bf16.mxu0 %v1777_v19 }
 0x11a   : > { %v3242_v48 = vunpack.i.h.bf16 %v3240_v2  ;;  %v3241_v7 = vunpack.i.l.bf16 %v3240_v2  ;;  %3524 = vrot.lane.b32.xlu0 %v3498_v9, %s3643_s12  ;;  %v1753_v35 = vld [vmem:[#allocation2 + $0x70] sm:$0xff]  ;;  %v1754_v49 = vld [vmem:[#allocation2 + $0x78] sm:$0xff] }
 0x11b   : > { %1054 = vst.msk [vmem:[#allocation2 + $0x80] sm:$0xff] %vm1037_vm5, %v3236_v62  ;;  %1055 = vst.msk [vmem:[#allocation2 + $0x88] sm:$0xff] %vm1037_vm5, %v3237_v46  ;;  %3529 = vrot.lane.b32.xlu1 %v3528_v45, %s3643_s12  ;;  %v1778_v57 = vpack.c.bf16 %v1754_v49, %v1753_v35  ;;  %s3563_s12 = scalar_lea.vmem %s3562_s21, 32 }
 0x11c   : > { %1056 = vst.msk [vmem:[#allocation2 + $0x90] sm:$0xff] %vm1037_vm5, %v3241_v7  ;;  %1057 = vst.msk [vmem:[#allocation2 + $0x98] sm:$0xff] %vm1037_vm5, %v3242_v48  ;;  %v3245_v13 = vpop.permute.xlu0 %3244  ;;  %p3565_p2 = scmp.lt.s32.totalorder %s3563_s12, %s3557_s15 }
 0x11d   : > { %v3247_v51 = vunpack.i.h.bf16 %v3245_v13  ;;  %v3246_v52 = vunpack.i.l.bf16 %v3245_v13  ;;  %v3250_v21 = vpop.permute.xlu1 %3249  ;;  %2740 = vmatmul.mubr.bf16.gmra.mxu0 %v1778_v57 }
 0x11e   : > { %v3252_v56 = vunpack.i.h.bf16 %v3250_v21  ;;  %v3251_v39 = vunpack.i.l.bf16 %v3250_v21  ;;  %p3566_p3 = por %p3565_p2, %p3564_p1 }
 0x11f   : > { %1189 = vst.msk [vmem:[#allocation2 + $0x80] sm:$0xff] %vm1172_vm6, %v3246_v52  ;;  %1190 = vst.msk [vmem:[#allocation2 + $0x88] sm:$0xff] %vm1172_vm6, %v3247_v51 }
 0x120   : > { %1191 = vst.msk [vmem:[#allocation2 + $0x90] sm:$0xff] %vm1172_vm6, %v3251_v39  ;;  %1192 = vst.msk [vmem:[#allocation2 + $0x98] sm:$0xff] %vm1172_vm6, %v3252_v56  ;;  %v3255_v5 = vpop.permute.xlu0 %3254  ;;  %p3567_p5 = pnand %p3566_p3, %p3560_p0 }
 0x121   : > { %v3257_v18 = vunpack.i.h.bf16 %v3255_v5  ;;  %v3256_v58 = vunpack.i.l.bf16 %v3255_v5  ;;  %v3260_v60 = vpop.permute.xlu1 %3259 }
 0x122   : > { %v3262_v24 = vunpack.i.h.bf16 %v3260_v60  ;;  %v3261_v53 = vunpack.i.l.bf16 %v3260_v60 }
 0x123   : > { %1323 = vst.msk [vmem:[#allocation2 + $0x80] sm:$0xff] %vm1306_vm7, %v3256_v58  ;;  %1324 = vst.msk [vmem:[#allocation2 + $0x88] sm:$0xff] %vm1306_vm7, %v3257_v18 }
 0x124   : > { %1325 = vst.msk [vmem:[#allocation2 + $0x90] sm:$0xff] %vm1306_vm7, %v3261_v53  ;;  %1326 = vst.msk [vmem:[#allocation2 + $0x98] sm:$0xff] %vm1306_vm7, %v3262_v24  ;;  %v3265_v14 = vpop.permute.xlu0 %3264 }
 0x125   : > { %v3267_v63 = vunpack.i.h.bf16 %v3265_v14  ;;  %v3266_v47 = vunpack.i.l.bf16 %v3265_v14  ;;  %v3270_v38 = vpop.permute.xlu1 %3269 }
 0x126   : > { %v3272_v1 = vunpack.i.h.bf16 %v3270_v38  ;;  %v3271_v59 = vunpack.i.l.bf16 %v3270_v38 }
 0x127   : > { %1454 = vst.msk [vmem:[#allocation2 + $0x80] sm:$0xff] %vm1437_vm8, %v3266_v47  ;;  %1455 = vst.msk [vmem:[#allocation2 + $0x88] sm:$0xff] %vm1437_vm8, %v3267_v63 }
 0x128   : > { %1456 = vst.msk [vmem:[#allocation2 + $0x90] sm:$0xff] %vm1437_vm8, %v3271_v59  ;;  %1457 = vst.msk [vmem:[#allocation2 + $0x98] sm:$0xff] %vm1437_vm8, %v3272_v1  ;;  %v3275_v34 = vpop.permute.xlu0 %3274 }
 0x129   : > { %v3277_v9 = vunpack.i.h.bf16 %v3275_v34  ;;  %v3276_v10 = vunpack.i.l.bf16 %v3275_v34  ;;  %v3280_v11 = vpop.permute.xlu1 %3279 }
 0x12a   : > { %v3282_v12 = vunpack.i.h.bf16 %v3280_v11  ;;  %v3281_v43 = vunpack.i.l.bf16 %v3280_v11 }
 0x12b   : > { %1589 = vst.msk [vmem:[#allocation2 + $0x80] sm:$0xff] %vm1572_vm9, %v3276_v10  ;;  %1590 = vst.msk [vmem:[#allocation2 + $0x88] sm:$0xff] %vm1572_vm9, %v3277_v9 }
 0x12c   : > { %1591 = vst.msk [vmem:[#allocation2 + $0x90] sm:$0xff] %vm1572_vm9, %v3281_v43  ;;  %1592 = vst.msk [vmem:[#allocation2 + $0x98] sm:$0xff] %vm1572_vm9, %v3282_v12  ;;  %v3285_v4 = vpop.permute.xlu0 %3284 }
 0x12d   : > { %v3287_v31 = vunpack.i.h.bf16 %v3285_v4  ;;  %v3286_v22 = vunpack.i.l.bf16 %v3285_v4  ;;  %v3290_v33 = vpop.permute.xlu1 %3289 }
 0x12e   : > { %v3292_v17 = vunpack.i.h.bf16 %v3290_v33  ;;  %v3291_v23 = vunpack.i.l.bf16 %v3290_v33 }
 0x12f   : > { %1723 = vst.msk [vmem:[#allocation2 + $0x80] sm:$0xff] %vm1706_vm10, %v3286_v22  ;;  %1724 = vst.msk [vmem:[#allocation2 + $0x88] sm:$0xff] %vm1706_vm10, %v3287_v31 }
 0x130   : > { %718 = vst.msk [vmem:[#allocation2 + $0xa8] sm:$0xff] %vm696_vm3, %v3292_v17  ;;  %717 = vst.msk [vmem:[#allocation2 + $0xa0] sm:$0xff] %vm696_vm3, %v3291_v23  ;;  %v3295_v15 = vpop.permute.xlu0 %3294 }
 0x131   : > { %v3297_v25 = vunpack.i.h.bf16 %v3295_v15  ;;  %v3296_v28 = vunpack.i.l.bf16 %v3295_v15  ;;  %v3300_v29 = vpop.permute.xlu1 %3299 }
 0x132   : > { %v3302_v30 = vunpack.i.h.bf16 %v3300_v29  ;;  %v3301_v3 = vunpack.i.l.bf16 %v3300_v29 }
 0x133   : > { %1726 = vst.msk [vmem:[#allocation2 + $0x98] sm:$0xff] %vm1706_vm10, %v3297_v25  ;;  %1725 = vst.msk [vmem:[#allocation2 + $0x90] sm:$0xff] %vm1706_vm10, %v3296_v28 }
 0x134   : > { %720 = vst.msk [vmem:[#allocation2 + $0xb8] sm:$0xff] %vm696_vm3, %v3302_v30  ;;  %719 = vst.msk [vmem:[#allocation2 + $0xb0] sm:$0xff] %vm696_vm3, %v3301_v3  ;;  %v3305_v40 = vpop.permute.xlu0 %3304 }
 0x135   : > { %v3307_v54 = vunpack.i.h.bf16 %v3305_v40  ;;  %v3306_v61 = vunpack.i.l.bf16 %v3305_v40  ;;  %v3310_v16 = vpop.permute.xlu1 %3309 }
 0x136   : > { %v3312_v37 = vunpack.i.h.bf16 %v3310_v16  ;;  %v3311_v26 = vunpack.i.l.bf16 %v3310_v16  ;;  %v1755_v50 = vld [vmem:[#allocation2 + $0x80] sm:$0xff]  ;;  %v1756_v8 = vld [vmem:[#allocation2 + $0x88] sm:$0xff] }
 0x137   : > { %928 = vst.msk [vmem:[#allocation2 + $0xa8] sm:$0xff] %vm906_vm4, %v3307_v54  ;;  %927 = vst.msk [vmem:[#allocation2 + $0xa0] sm:$0xff] %vm906_vm4, %v3306_v61  ;;  %v1779_v27 = vpack.c.bf16 %v1756_v8, %v1755_v50 }
 0x138   : > { %929 = vst.msk [vmem:[#allocation2 + $0xb0] sm:$0xff] %vm906_vm4, %v3311_v26  ;;  %930 = vst.msk [vmem:[#allocation2 + $0xb8] sm:$0xff] %vm906_vm4, %v3312_v37  ;;  %v3315_v41 = vpop.permute.xlu0 %3314 }
 0x139   : > { %v3317_v42 = vunpack.i.h.bf16 %v3315_v41  ;;  %v3316_v32 = vunpack.i.l.bf16 %v3315_v41  ;;  %v3320_v44 = vpop.permute.xlu1 %3319  ;;  %2743 = vmatprep.mubr.bf16.mxu0 %v1779_v27 }
 0x13a   : > { %v3322_v20 = vunpack.i.h.bf16 %v3320_v44  ;;  %v3321_v6 = vunpack.i.l.bf16 %v3320_v44  ;;  %v1757_v36 = vld [vmem:[#allocation2 + $0x90] sm:$0xff]  ;;  %v1758_v19 = vld [vmem:[#allocation2 + $0x98] sm:$0xff] }
 0x13b   : > { %1058 = vst.msk [vmem:[#allocation2 + $0xa0] sm:$0xff] %vm1037_vm5, %v3316_v32  ;;  %1059 = vst.msk [vmem:[#allocation2 + $0xa8] sm:$0xff] %vm1037_vm5, %v3317_v42  ;;  %v1780_v45 = vpack.c.bf16 %v1758_v19, %v1757_v36 }
 0x13c   : > { %1060 = vst.msk [vmem:[#allocation2 + $0xb0] sm:$0xff] %vm1037_vm5, %v3321_v6  ;;  %1061 = vst.msk [vmem:[#allocation2 + $0xb8] sm:$0xff] %vm1037_vm5, %v3322_v20  ;;  %v3325_v55 = vpop.permute.xlu0 %3324 }
 0x13d   : > { %v3327_v46 = vunpack.i.h.bf16 %v3325_v55  ;;  %v3326_v62 = vunpack.i.l.bf16 %v3325_v55  ;;  %v3330_v2 = vpop.permute.xlu1 %3329  ;;  %2744 = vmatmul.mubr.bf16.gmra.mxu0 %v1780_v45 }
 0x13e   : > { %v3332_v48 = vunpack.i.h.bf16 %v3330_v2  ;;  %v3331_v7 = vunpack.i.l.bf16 %v3330_v2 }
 0x13f   : > { %1193 = vst.msk [vmem:[#allocation2 + $0xa0] sm:$0xff] %vm1172_vm6, %v3326_v62  ;;  %1194 = vst.msk [vmem:[#allocation2 + $0xa8] sm:$0xff] %vm1172_vm6, %v3327_v46 }
 0x140   : > { %1195 = vst.msk [vmem:[#allocation2 + $0xb0] sm:$0xff] %vm1172_vm6, %v3331_v7  ;;  %1196 = vst.msk [vmem:[#allocation2 + $0xb8] sm:$0xff] %vm1172_vm6, %v3332_v48  ;;  %v3335_v35 = vpop.permute.xlu0 %3334 }
 0x141   : > { %v3337_v49 = vunpack.i.h.bf16 %v3335_v35  ;;  %v3336_v57 = vunpack.i.l.bf16 %v3335_v35  ;;  %v3340_v13 = vpop.permute.xlu1 %3339 }
 0x142   : > { %v3342_v51 = vunpack.i.h.bf16 %v3340_v13  ;;  %v3341_v52 = vunpack.i.l.bf16 %v3340_v13 }
 0x143   : > { %1327 = vst.msk [vmem:[#allocation2 + $0xa0] sm:$0xff] %vm1306_vm7, %v3336_v57  ;;  %1328 = vst.msk [vmem:[#allocation2 + $0xa8] sm:$0xff] %vm1306_vm7, %v3337_v49 }
 0x144   : > { %1329 = vst.msk [vmem:[#allocation2 + $0xb0] sm:$0xff] %vm1306_vm7, %v3341_v52  ;;  %1330 = vst.msk [vmem:[#allocation2 + $0xb8] sm:$0xff] %vm1306_vm7, %v3342_v51  ;;  %v3345_v21 = vpop.permute.xlu0 %3344 }
 0x145   : > { %v3347_v56 = vunpack.i.h.bf16 %v3345_v21  ;;  %v3346_v39 = vunpack.i.l.bf16 %v3345_v21  ;;  %v3350_v5 = vpop.permute.xlu1 %3349 }
 0x146   : > { %v3352_v18 = vunpack.i.h.bf16 %v3350_v5  ;;  %v3351_v58 = vunpack.i.l.bf16 %v3350_v5 }
 0x147   : > { %1458 = vst.msk [vmem:[#allocation2 + $0xa0] sm:$0xff] %vm1437_vm8, %v3346_v39  ;;  %1459 = vst.msk [vmem:[#allocation2 + $0xa8] sm:$0xff] %vm1437_vm8, %v3347_v56 }
 0x148   : > { %1460 = vst.msk [vmem:[#allocation2 + $0xb0] sm:$0xff] %vm1437_vm8, %v3351_v58  ;;  %1461 = vst.msk [vmem:[#allocation2 + $0xb8] sm:$0xff] %vm1437_vm8, %v3352_v18  ;;  %v3355_v60 = vpop.permute.xlu0 %3354 }
 0x149   : > { %v3357_v24 = vunpack.i.h.bf16 %v3355_v60  ;;  %v3356_v53 = vunpack.i.l.bf16 %v3355_v60  ;;  %v3360_v14 = vpop.permute.xlu1 %3359 }
 0x14a   : > { %v3362_v63 = vunpack.i.h.bf16 %v3360_v14  ;;  %v3361_v47 = vunpack.i.l.bf16 %v3360_v14 }
 0x14b   : > { %1593 = vst.msk [vmem:[#allocation2 + $0xa0] sm:$0xff] %vm1572_vm9, %v3356_v53  ;;  %1594 = vst.msk [vmem:[#allocation2 + $0xa8] sm:$0xff] %vm1572_vm9, %v3357_v24 }
 0x14c   : > { %1595 = vst.msk [vmem:[#allocation2 + $0xb0] sm:$0xff] %vm1572_vm9, %v3361_v47  ;;  %1596 = vst.msk [vmem:[#allocation2 + $0xb8] sm:$0xff] %vm1572_vm9, %v3362_v63  ;;  %v3365_v38 = vpop.permute.xlu0 %3364 }
 0x14d   : > { %v3367_v1 = vunpack.i.h.bf16 %v3365_v38  ;;  %v3366_v59 = vunpack.i.l.bf16 %v3365_v38  ;;  %v3370_v34 = vpop.permute.xlu1 %3369 }
 0x14e   : > { %v3372_v9 = vunpack.i.h.bf16 %v3370_v34  ;;  %v3371_v10 = vunpack.i.l.bf16 %v3370_v34 }
 0x14f   : > { %1727 = vst.msk [vmem:[#allocation2 + $0xa0] sm:$0xff] %vm1706_vm10, %v3366_v59  ;;  %1728 = vst.msk [vmem:[#allocation2 + $0xa8] sm:$0xff] %vm1706_vm10, %v3367_v1 }
 0x150   : > { %722 = vst.msk [vmem:[#allocation2 + $0xc8] sm:$0xff] %vm696_vm3, %v3372_v9  ;;  %721 = vst.msk [vmem:[#allocation2 + $0xc0] sm:$0xff] %vm696_vm3, %v3371_v10  ;;  %v3375_v11 = vpop.permute.xlu0 %3374 }
 0x151   : > { %v3377_v12 = vunpack.i.h.bf16 %v3375_v11  ;;  %v3376_v43 = vunpack.i.l.bf16 %v3375_v11  ;;  %v3380_v4 = vpop.permute.xlu1 %3379 }
 0x152   : > { %v3382_v31 = vunpack.i.h.bf16 %v3380_v4  ;;  %v3381_v22 = vunpack.i.l.bf16 %v3380_v4 }
 0x153   : > { %1730 = vst.msk [vmem:[#allocation2 + $0xb8] sm:$0xff] %vm1706_vm10, %v3377_v12  ;;  %1729 = vst.msk [vmem:[#allocation2 + $0xb0] sm:$0xff] %vm1706_vm10, %v3376_v43 }
 0x154   : > { %724 = vst.msk [vmem:[#allocation2 + $0xd8] sm:$0xff] %vm696_vm3, %v3382_v31  ;;  %723 = vst.msk [vmem:[#allocation2 + $0xd0] sm:$0xff] %vm696_vm3, %v3381_v22  ;;  %v3385_v33 = vpop.permute.xlu0 %3384 }
 0x155   : > { %v3387_v17 = vunpack.i.h.bf16 %v3385_v33  ;;  %v3386_v23 = vunpack.i.l.bf16 %v3385_v33  ;;  %v3390_v15 = vpop.permute.xlu1 %3389 }
 0x156   : > { %v3392_v25 = vunpack.i.h.bf16 %v3390_v15  ;;  %v3391_v28 = vunpack.i.l.bf16 %v3390_v15  ;;  %v1759_v29 = vld [vmem:[#allocation2 + $0xa0] sm:$0xff]  ;;  %v1760_v30 = vld [vmem:[#allocation2 + $0xa8] sm:$0xff] }
 0x157   : > { %932 = vst.msk [vmem:[#allocation2 + $0xc8] sm:$0xff] %vm906_vm4, %v3387_v17  ;;  %931 = vst.msk [vmem:[#allocation2 + $0xc0] sm:$0xff] %vm906_vm4, %v3386_v23  ;;  %v1781_v3 = vpack.c.bf16 %v1760_v30, %v1759_v29 }
 0x158   : > { %933 = vst.msk [vmem:[#allocation2 + $0xd0] sm:$0xff] %vm906_vm4, %v3391_v28  ;;  %934 = vst.msk [vmem:[#allocation2 + $0xd8] sm:$0xff] %vm906_vm4, %v3392_v25  ;;  %v3395_v40 = vpop.permute.xlu0 %3394 }
 0x159   : > { %v3397_v54 = vunpack.i.h.bf16 %v3395_v40  ;;  %v3396_v61 = vunpack.i.l.bf16 %v3395_v40  ;;  %v3400_v16 = vpop.permute.xlu1 %3399  ;;  %2747 = vmatprep.mubr.bf16.mxu0 %v1781_v3 }
 0x15a   : > { %v3402_v37 = vunpack.i.h.bf16 %v3400_v16  ;;  %v3401_v26 = vunpack.i.l.bf16 %v3400_v16  ;;  %v1761_v50 = vld [vmem:[#allocation2 + $0xb0] sm:$0xff]  ;;  %v1762_v8 = vld [vmem:[#allocation2 + $0xb8] sm:$0xff] }
 0x15b   : > { %1062 = vst.msk [vmem:[#allocation2 + $0xc0] sm:$0xff] %vm1037_vm5, %v3396_v61  ;;  %1063 = vst.msk [vmem:[#allocation2 + $0xc8] sm:$0xff] %vm1037_vm5, %v3397_v54  ;;  %v1782_v27 = vpack.c.bf16 %v1762_v8, %v1761_v50 }
 0x15c   : > { %1064 = vst.msk [vmem:[#allocation2 + $0xd0] sm:$0xff] %vm1037_vm5, %v3401_v26  ;;  %1065 = vst.msk [vmem:[#allocation2 + $0xd8] sm:$0xff] %vm1037_vm5, %v3402_v37  ;;  %v3405_v41 = vpop.permute.xlu0 %3404 }
 0x15d   : > { %v3407_v42 = vunpack.i.h.bf16 %v3405_v41  ;;  %v3406_v32 = vunpack.i.l.bf16 %v3405_v41  ;;  %v3410_v44 = vpop.permute.xlu1 %3409  ;;  %2748 = vmatmul.mubr.bf16.gmra.mxu0 %v1782_v27  ;;  %v4601_v27 = vld [vmem:[%s4776_s2] ss:$0 sm:$0xff] }
 0x15e   : > { %v3412_v20 = vunpack.i.h.bf16 %v3410_v44  ;;  %v3411_v6 = vunpack.i.l.bf16 %v3410_v44 }
 0x15f   : > { %1197 = vst.msk [vmem:[#allocation2 + $0xc0] sm:$0xff] %vm1172_vm6, %v3406_v32  ;;  %1198 = vst.msk [vmem:[#allocation2 + $0xc8] sm:$0xff] %vm1172_vm6, %v3407_v42 }
 0x160   : > { %1199 = vst.msk [vmem:[#allocation2 + $0xd0] sm:$0xff] %vm1172_vm6, %v3411_v6  ;;  %1200 = vst.msk [vmem:[#allocation2 + $0xd8] sm:$0xff] %vm1172_vm6, %v3412_v20  ;;  %v3415_v36 = vpop.permute.xlu0 %3414 }
 0x161   : > { %v3417_v19 = vunpack.i.h.bf16 %v3415_v36  ;;  %v3416_v45 = vunpack.i.l.bf16 %v3415_v36  ;;  %v3420_v55 = vpop.permute.xlu1 %3419 }
 0x162   : > { %v3422_v46 = vunpack.i.h.bf16 %v3420_v55  ;;  %v3421_v62 = vunpack.i.l.bf16 %v3420_v55 }
 0x163   : > { %1331 = vst.msk [vmem:[#allocation2 + $0xc0] sm:$0xff] %vm1306_vm7, %v3416_v45  ;;  %1332 = vst.msk [vmem:[#allocation2 + $0xc8] sm:$0xff] %vm1306_vm7, %v3417_v19 }
 0x164   : > { %1333 = vst.msk [vmem:[#allocation2 + $0xd0] sm:$0xff] %vm1306_vm7, %v3421_v62  ;;  %1334 = vst.msk [vmem:[#allocation2 + $0xd8] sm:$0xff] %vm1306_vm7, %v3422_v46  ;;  %v3425_v2 = vpop.permute.xlu0 %3424 }
 0x165   : > { %v3427_v48 = vunpack.i.h.bf16 %v3425_v2  ;;  %v3426_v7 = vunpack.i.l.bf16 %v3425_v2  ;;  %v3430_v35 = vpop.permute.xlu1 %3429 }
 0x166   : > { %v3432_v49 = vunpack.i.h.bf16 %v3430_v35  ;;  %v3431_v57 = vunpack.i.l.bf16 %v3430_v35 }
 0x167   : > { %1462 = vst.msk [vmem:[#allocation2 + $0xc0] sm:$0xff] %vm1437_vm8, %v3426_v7  ;;  %1463 = vst.msk [vmem:[#allocation2 + $0xc8] sm:$0xff] %vm1437_vm8, %v3427_v48 }
 0x168   : > { %1464 = vst.msk [vmem:[#allocation2 + $0xd0] sm:$0xff] %vm1437_vm8, %v3431_v57  ;;  %1465 = vst.msk [vmem:[#allocation2 + $0xd8] sm:$0xff] %vm1437_vm8, %v3432_v49  ;;  %v3435_v13 = vpop.permute.xlu0 %3434 }
 0x169   : > { %v3437_v51 = vunpack.i.h.bf16 %v3435_v13  ;;  %v3436_v52 = vunpack.i.l.bf16 %v3435_v13  ;;  %v3440_v21 = vpop.permute.xlu1 %3439 }
 0x16a   : > { %v3442_v56 = vunpack.i.h.bf16 %v3440_v21  ;;  %v3441_v39 = vunpack.i.l.bf16 %v3440_v21 }
 0x16b   : > { %1597 = vst.msk [vmem:[#allocation2 + $0xc0] sm:$0xff] %vm1572_vm9, %v3436_v52  ;;  %1598 = vst.msk [vmem:[#allocation2 + $0xc8] sm:$0xff] %vm1572_vm9, %v3437_v51 }
 0x16c   : > { %1599 = vst.msk [vmem:[#allocation2 + $0xd0] sm:$0xff] %vm1572_vm9, %v3441_v39  ;;  %1600 = vst.msk [vmem:[#allocation2 + $0xd8] sm:$0xff] %vm1572_vm9, %v3442_v56  ;;  %v3445_v5 = vpop.permute.xlu0 %3444 }
 0x16d   : > { %v3447_v18 = vunpack.i.h.bf16 %v3445_v5  ;;  %v3446_v58 = vunpack.i.l.bf16 %v3445_v5  ;;  %v3450_v60 = vpop.permute.xlu1 %3449 }
 0x16e   : > { %v3452_v24 = vunpack.i.h.bf16 %v3450_v60  ;;  %v3451_v53 = vunpack.i.l.bf16 %v3450_v60 }
 0x16f   : > { %1731 = vst.msk [vmem:[#allocation2 + $0xc0] sm:$0xff] %vm1706_vm10, %v3446_v58  ;;  %1732 = vst.msk [vmem:[#allocation2 + $0xc8] sm:$0xff] %vm1706_vm10, %v3447_v18 }
 0x170   : > { %726 = vst.msk [vmem:[#allocation2 + $0xe8] sm:$0xff] %vm696_vm3, %v3452_v24  ;;  %725 = vst.msk [vmem:[#allocation2 + $0xe0] sm:$0xff] %vm696_vm3, %v3451_v53  ;;  %v3455_v14 = vpop.permute.xlu0 %3454 }
 0x171   : > { %v3457_v63 = vunpack.i.h.bf16 %v3455_v14  ;;  %v3456_v47 = vunpack.i.l.bf16 %v3455_v14  ;;  %v3460_v38 = vpop.permute.xlu1 %3459 }
 0x172   : > { %v3462_v1 = vunpack.i.h.bf16 %v3460_v38  ;;  %v3461_v59 = vunpack.i.l.bf16 %v3460_v38 }
 0x173   : > { %1734 = vst.msk [vmem:[#allocation2 + $0xd8] sm:$0xff] %vm1706_vm10, %v3457_v63  ;;  %1733 = vst.msk [vmem:[#allocation2 + $0xd0] sm:$0xff] %vm1706_vm10, %v3456_v47 }
 0x174   : > { %728 = vst.msk [vmem:[#allocation2 + $0xf8] sm:$0xff] %vm696_vm3, %v3462_v1  ;;  %727 = vst.msk [vmem:[#allocation2 + $0xf0] sm:$0xff] %vm696_vm3, %v3461_v59  ;;  %v3465_v34 = vpop.permute.xlu0 %3464 }
 0x175   : > { %v3467_v9 = vunpack.i.h.bf16 %v3465_v34  ;;  %v3466_v10 = vunpack.i.l.bf16 %v3465_v34  ;;  %v3470_v11 = vpop.permute.xlu1 %3469 }
 0x176   : > { %v3472_v12 = vunpack.i.h.bf16 %v3470_v11  ;;  %v3471_v43 = vunpack.i.l.bf16 %v3470_v11  ;;  %v1763_v4 = vld [vmem:[#allocation2 + $0xc0] sm:$0xff]  ;;  %v1764_v31 = vld [vmem:[#allocation2 + $0xc8] sm:$0xff] }
 0x177   : > { %936 = vst.msk [vmem:[#allocation2 + $0xe8] sm:$0xff] %vm906_vm4, %v3467_v9  ;;  %935 = vst.msk [vmem:[#allocation2 + $0xe0] sm:$0xff] %vm906_vm4, %v3466_v10  ;;  %v1783_v22 = vpack.c.bf16 %v1764_v31, %v1763_v4 }
 0x178   : > { %937 = vst.msk [vmem:[#allocation2 + $0xf0] sm:$0xff] %vm906_vm4, %v3471_v43  ;;  %938 = vst.msk [vmem:[#allocation2 + $0xf8] sm:$0xff] %vm906_vm4, %v3472_v12  ;;  %v3475_v33 = vpop.permute.xlu0 %3474 }
 0x179   : > { %v3477_v17 = vunpack.i.h.bf16 %v3475_v33  ;;  %v3476_v23 = vunpack.i.l.bf16 %v3475_v33  ;;  %v3480_v15 = vpop.permute.xlu1 %3479  ;;  %2751 = vmatprep.mubr.bf16.mxu0 %v1783_v22 }
 0x17a   : > { %v3482_v25 = vunpack.i.h.bf16 %v3480_v15  ;;  %v3481_v28 = vunpack.i.l.bf16 %v3480_v15  ;;  %v1765_v29 = vld [vmem:[#allocation2 + $0xd0] sm:$0xff]  ;;  %v1766_v30 = vld [vmem:[#allocation2 + $0xd8] sm:$0xff] }
 0x17b   : > { %1066 = vst.msk [vmem:[#allocation2 + $0xe0] sm:$0xff] %vm1037_vm5, %v3476_v23  ;;  %1067 = vst.msk [vmem:[#allocation2 + $0xe8] sm:$0xff] %vm1037_vm5, %v3477_v17  ;;  %v1784_v3 = vpack.c.bf16 %v1766_v30, %v1765_v29 }
 0x17c   : > { %1068 = vst.msk [vmem:[#allocation2 + $0xf0] sm:$0xff] %vm1037_vm5, %v3481_v28  ;;  %1069 = vst.msk [vmem:[#allocation2 + $0xf8] sm:$0xff] %vm1037_vm5, %v3482_v25  ;;  %v3485_v40 = vpop.permute.xlu0 %3484 }
 0x17d   : > { %v3487_v54 = vunpack.i.h.bf16 %v3485_v40  ;;  %v3486_v61 = vunpack.i.l.bf16 %v3485_v40  ;;  %v3490_v16 = vpop.permute.xlu1 %3489  ;;  %v2729_v37 = vpop.f32.mrf.mxu0  ;;  %2752 = vmatmul.mubr.bf16.gmra.mxu0 %v1784_v3 }
 0x17e   : > { %v3492_v26 = vunpack.i.h.bf16 %v3490_v16  ;;  %v3491_v50 = vunpack.i.l.bf16 %v3490_v16  ;;  %v1901_v55 = vadd.f32 %v2729_v37, %v4601_v27 }
 0x17f   : > { %1201 = vst.msk [vmem:[#allocation2 + $0xe0] sm:$0xff] %vm1172_vm6, %v3486_v61  ;;  %1202 = vst.msk [vmem:[#allocation2 + $0xe8] sm:$0xff] %vm1172_vm6, %v3487_v54  ;;  %v1892_v8 = vpop.f32.mrf.mxu0 }
 0x180   : > { %1203 = vst.msk [vmem:[#allocation2 + $0xf0] sm:$0xff] %vm1172_vm6, %v3491_v50  ;;  %1204 = vst.msk [vmem:[#allocation2 + $0xf8] sm:$0xff] %vm1172_vm6, %v3492_v26  ;;  %v3495_v41 = vpop.permute.xlu0 %3494  ;;  %v1893_v6 = vadd.f32 %v4601_v27, %v1892_v8  ;;  %v2021_v21 = vmax.f32 %v1901_v55, 0.0 }
 0x181   : > { %v3497_v42 = vunpack.i.h.bf16 %v3495_v41  ;;  %v3496_v32 = vunpack.i.l.bf16 %v3495_v41  ;;  %v3500_v44 = vpop.permute.xlu1 %3499  ;;  %v2730_v20 = vpop.f32.mrf.mxu0 }
 0x182   : > { %v3502_v36 = vunpack.i.h.bf16 %v3500_v44  ;;  %v3501_v19 = vunpack.i.l.bf16 %v3500_v44  ;;  %v1904_v45 = vadd.f32 %v2730_v20, %v4601_v27  ;;  %v2019_v57 = vmax.f32 %v1893_v6, 0.0 }
 0x183   : > { %1335 = vst.msk [vmem:[#allocation2 + $0xe0] sm:$0xff] %vm1306_vm7, %v3496_v32  ;;  %1336 = vst.msk [vmem:[#allocation2 + $0xe8] sm:$0xff] %vm1306_vm7, %v3497_v42  ;;  %v1895_v46 = vpop.f32.mrf.mxu0 }
 0x184   : > { %1337 = vst.msk [vmem:[#allocation2 + $0xf0] sm:$0xff] %vm1306_vm7, %v3501_v19  ;;  %1338 = vst.msk [vmem:[#allocation2 + $0xf8] sm:$0xff] %vm1306_vm7, %v3502_v36  ;;  %v1896_v62 = vadd.f32 %v4601_v27, %v1895_v46  ;;  %v3505_v2 = vpop.permute.xlu0 %3504  ;;  %v2022_v48 = vmax.f32 %v1904_v45, 0.0 }
 0x185   : > { %v3507_v7 = vunpack.i.h.bf16 %v3505_v2  ;;  %v3506_v35 = vunpack.i.l.bf16 %v3505_v2  ;;  %v3510_v49 = vpop.permute.xlu1 %3509 }
 0x186   : > { %v2020_v13 = vmax.f32 %v1896_v62, 0.0  ;;  %v3512_v51 = vunpack.i.h.bf16 %v3510_v49  ;;  %v3511_v52 = vunpack.i.l.bf16 %v3510_v49  ;;  %v2052_v5 = vpack.c.bf16 %v2022_v48, %v2021_v21 }
 0x187   : > { %1466 = vst.msk [vmem:[#allocation2 + $0xe0] sm:$0xff] %vm1437_vm8, %v3506_v35  ;;  %1467 = vst.msk [vmem:[#allocation2 + $0xe8] sm:$0xff] %vm1437_vm8, %v3507_v7 }
 0x188   : > { %1468 = vst.msk [vmem:[#allocation2 + $0xf0] sm:$0xff] %vm1437_vm8, %v3511_v52  ;;  %1469 = vst.msk [vmem:[#allocation2 + $0xf8] sm:$0xff] %vm1437_vm8, %v3512_v51  ;;  %v3515_v56 = vpop.permute.xlu0 %3514  ;;  %v2051_v39 = vpack.c.bf16 %v2020_v13, %v2019_v57 }
 0x189   : > { %v3517_v18 = vunpack.i.h.bf16 %v3515_v56  ;;  %v3516_v58 = vunpack.i.l.bf16 %v3515_v56  ;;  %v3520_v60 = vpop.permute.xlu1 %3519 }
 0x18a   : > { %v3522_v24 = vunpack.i.h.bf16 %v3520_v60  ;;  %v3521_v53 = vunpack.i.l.bf16 %v3520_v60  ;;  %2775 = vmatprep.mubr.bf16.mxu1 %v2051_v39 }
 0x18b   : > { %1601 = vst.msk [vmem:[#allocation2 + $0xe0] sm:$0xff] %vm1572_vm9, %v3516_v58  ;;  %1602 = vst.msk [vmem:[#allocation2 + $0xe8] sm:$0xff] %vm1572_vm9, %v3517_v18  ;;  %2776 = vmatmul.mubr.bf16.vlgmr.msra.gmra.mxu1 %v2052_v5 }
 0x18c   : > { %1603 = vst.msk [vmem:[#allocation2 + $0xf0] sm:$0xff] %vm1572_vm9, %v3521_v53  ;;  %1604 = vst.msk [vmem:[#allocation2 + $0xf8] sm:$0xff] %vm1572_vm9, %v3522_v24  ;;  %v3525_v14 = vpop.permute.xlu0 %3524 }
 0x18d   : > { %v3527_v63 = vunpack.i.h.bf16 %v3525_v14  ;;  %v3526_v47 = vunpack.i.l.bf16 %v3525_v14  ;;  %v3530_v38 = vpop.permute.xlu1 %3529 }
 0x18e   : > { %v3532_v1 = vunpack.i.h.bf16 %v3530_v38  ;;  %v3531_v59 = vunpack.i.l.bf16 %v3530_v38 }
 0x18f   : > { %1735 = vst.msk [vmem:[#allocation2 + $0xe0] sm:$0xff] %vm1706_vm10, %v3526_v47  ;;  %1736 = vst.msk [vmem:[#allocation2 + $0xe8] sm:$0xff] %vm1706_vm10, %v3527_v63 }
 0x190   : > { %1737 = vst.msk [vmem:[#allocation2 + $0xf0] sm:$0xff] %vm1706_vm10, %v3531_v59  ;;  %1738 = vst.msk [vmem:[#allocation2 + $0xf8] sm:$0xff] %vm1706_vm10, %v3532_v1 }
 0x196   : > { %v1767_v34 = vld [vmem:[#allocation2 + $0xe0] sm:$0xff]  ;;  %v1768_v9 = vld [vmem:[#allocation2 + $0xe8] sm:$0xff] }
 0x197   : > { %v1785_v10 = vpack.c.bf16 %v1768_v9, %v1767_v34  ;;  %v1769_v11 = vld [vmem:[#allocation2 + $0xf0] sm:$0xff]  ;;  %v1770_v12 = vld [vmem:[#allocation2 + $0xf8] sm:$0xff] }
 0x198   : > { %v1786_v43 = vpack.c.bf16 %v1770_v12, %v1769_v11 }
 0x199   : > { %2755 = vmatprep.mubr.bf16.mxu0 %v1785_v10 }
 0x19a   : > { %2756 = vmatmul.mubr.bf16.gmra.mxu0 %v1786_v43 }
 0x19b   : > { %2823 = vmatprep.mubr.msk.bf16.mxu0 %vm3644_vm11, %v3635_v0 }
 0x19d   : > { %v2733_v4 = vpop.f32.mrf.mxu0 }
 0x19e   : > { %v1917_v23 = vadd.f32 %v2733_v4, %v4601_v27 }
 0x19f   : > { %v1908_v31 = vpop.f32.mrf.mxu0 }
 0x1a0   : > { %v1909_v33 = vadd.f32 %v4601_v27, %v1908_v31  ;;  %v2025_v3 = vmax.f32 %v1917_v23, 0.0 }
 0x1a1   : > { %v2734_v22 = vpop.f32.mrf.mxu0 }
 0x1a2   : > { %v1920_v17 = vadd.f32 %v2734_v22, %v4601_v27  ;;  %v2023_v29 = vmax.f32 %v1909_v33, 0.0 }
 0x1a3   : > { %v1911_v15 = vpop.f32.mrf.mxu0 }
 0x1a4   : > { %v1912_v25 = vadd.f32 %v4601_v27, %v1911_v15  ;;  %v2026_v28 = vmax.f32 %v1920_v17, 0.0 }
 0x1a6   : > { %v2024_v30 = vmax.f32 %v1912_v25, 0.0  ;;  %v2054_v54 = vpack.c.bf16 %v2026_v28, %v2025_v3 }
 0x1a8   : > { %v2053_v40 = vpack.c.bf16 %v2024_v30, %v2023_v29 }
 0x1aa   : > { %2779 = vmatprep.mubr.bf16.mxu1 %v2053_v40 }
 0x1ab   : > { %2780 = vmatmul.mubr.bf16.gmra.mxu1 %v2054_v54 }
 0x1bd   : > { %v2737_v61 = vpop.f32.mrf.mxu0 }
 0x1be   : > { %v1933_v8 = vadd.f32 %v2737_v61, %v4601_v27 }
 0x1bf   : > { %v1924_v16 = vpop.f32.mrf.mxu0 }
 0x1c0   : > { %v1925_v26 = vadd.f32 %v4601_v27, %v1924_v16  ;;  %v2029_v6 = vmax.f32 %v1933_v8, 0.0 }
 0x1c1   : > { %v2738_v37 = vpop.f32.mrf.mxu0 }
 0x1c2   : > { %v1936_v50 = vadd.f32 %v2738_v37, %v4601_v27  ;;  %v2027_v44 = vmax.f32 %v1925_v26, 0.0 }
 0x1c3   : > { %v1927_v41 = vpop.f32.mrf.mxu0 }
 0x1c4   : > { %v1928_v42 = vadd.f32 %v4601_v27, %v1927_v41  ;;  %v2030_v32 = vmax.f32 %v1936_v50, 0.0 }
 0x1c6   : > { %v2028_v20 = vmax.f32 %v1928_v42, 0.0  ;;  %v2056_v19 = vpack.c.bf16 %v2030_v32, %v2029_v6 }
 0x1c8   : > { %v2055_v36 = vpack.c.bf16 %v2028_v20, %v2027_v44 }
 0x1ca   : > { %2783 = vmatprep.mubr.bf16.mxu1 %v2055_v36 }
 0x1cb   : > { %2784 = vmatmul.mubr.bf16.gmra.mxu1 %v2056_v19 }
 0x1dd   : > { %v2741_v45 = vpop.f32.mrf.mxu0 }
 0x1de   : > { %v1949_v48 = vadd.f32 %v2741_v45, %v4601_v27 }
 0x1df   : > { %v1940_v55 = vpop.f32.mrf.mxu0 }
 0x1e0   : > { %v1941_v62 = vadd.f32 %v4601_v27, %v1940_v55  ;;  %v2033_v51 = vmax.f32 %v1949_v48, 0.0 }
 0x1e1   : > { %v2742_v46 = vpop.f32.mrf.mxu0 }
 0x1e2   : > { %v1952_v2 = vadd.f32 %v2742_v46, %v4601_v27  ;;  %v2031_v57 = vmax.f32 %v1941_v62, 0.0 }
 0x1e3   : > { %v1943_v7 = vpop.f32.mrf.mxu0 }
 0x1e4   : > { %v1944_v35 = vadd.f32 %v4601_v27, %v1943_v7  ;;  %v2034_v49 = vmax.f32 %v1952_v2, 0.0 }
 0x1e6   : > { %v2032_v13 = vmax.f32 %v1944_v35, 0.0  ;;  %v2058_v21 = vpack.c.bf16 %v2034_v49, %v2033_v51  ;;  %v3549_v49 = vld [vmem:[%s4779_s5 + $0x38] sm:$0xff]  }
 0x1e7   : > { %2808 = vmatpush3.bf16.msra.mxu0 %v3549_v49 }
 0x1e8   : > { %v2057_v52 = vpack.c.bf16 %v2032_v13, %v2031_v57  ;;  %v3550_v57 = vld [vmem:[%s4779_s5 + $0x30] sm:$0xff]   ;;  %2809 = vmatprep.subr.bf16.mxu0 %v3635_v0 }
 0x1ea   : > { %2787 = vmatprep.mubr.bf16.mxu1 %v2057_v52  ;;  %v3552_v52 = vld [vmem:[%s4779_s5 + $0x20] sm:$0xff]  }
 0x1eb   : > { %2788 = vmatmul.mubr.bf16.gmra.mxu1 %v2058_v21  ;;  %2810 = vmatpush3.bf16.msra.mxu0 %v3550_v57 }
 0x1ec   : > { %2811 = vmatprep.subr.bf16.mxu0 %v3635_v0 }
 0x1fd   : > { %v2745_v56 = vpop.f32.mrf.mxu0 }
 0x1fe   : > { %v1965_v60 = vadd.f32 %v2745_v56, %v4601_v27  ;;  %v3553_v56 = vld [vmem:[%s4779_s5 + $0x18] sm:$0xff]  }
 0x1ff   : > { %v1956_v39 = vpop.f32.mrf.mxu0 }
 0x200   : > { %v1957_v18 = vadd.f32 %v4601_v27, %v1956_v39  ;;  %v2037_v38 = vmax.f32 %v1965_v60, 0.0 }
 0x201   : > { %v2746_v5 = vpop.f32.mrf.mxu0 }
 0x202   : > { %v1968_v58 = vadd.f32 %v2746_v5, %v4601_v27  ;;  %v2035_v63 = vmax.f32 %v1957_v18, 0.0  ;;  %v3554_v5 = vld [vmem:[%s4779_s5 + $0x10] sm:$0xff]  }
 0x203   : > { %v1959_v24 = vpop.f32.mrf.mxu0 }
 0x204   : > { %v1960_v53 = vadd.f32 %v4601_v27, %v1959_v24  ;;  %v2038_v14 = vmax.f32 %v1968_v58, 0.0  ;;  %v3555_v58 = vld [vmem:[%s4779_s5 + $0x8] sm:$0xff]   ;;  %v3556_v24 = vld [vmem:[%s4779_s5] sm:$0xff]  }
 0x206   : > { %v2036_v47 = vmax.f32 %v1960_v53, 0.0  ;;  %v2060_v59 = vpack.c.bf16 %v2038_v14, %v2037_v38  ;;  %v4686_v14 = vld [vmem:[%s4778_s4] ss:$0 sm:$0xff] }
 0x208   : > { %v2059_v1 = vpack.c.bf16 %v2036_v47, %v2035_v63 }
 0x20a   : > { %2791 = vmatprep.mubr.bf16.mxu1 %v2059_v1 }
 0x20b   : > { %2792 = vmatmul.mubr.bf16.gmra.mxu1 %v2060_v59 }
 0x21d   : > { %v2749_v34 = vpop.f32.mrf.mxu0 }
 0x21e   : > { %v1981_v43 = vadd.f32 %v2749_v34, %v4601_v27 }
 0x21f   : > { %v1972_v9 = vpop.f32.mrf.mxu0 }
 0x220   : > { %v1973_v11 = vadd.f32 %v4601_v27, %v1972_v9  ;;  %v2041_v23 = vmax.f32 %v1981_v43, 0.0 }
 0x221   : > { %v2750_v10 = vpop.f32.mrf.mxu0 }
 0x222   : > { %v1984_v12 = vadd.f32 %v2750_v10, %v4601_v27  ;;  %v2039_v33 = vmax.f32 %v1973_v11, 0.0 }
 0x223   : > { %v1975_v4 = vpop.f32.mrf.mxu0 }
 0x224   : > { %v1976_v31 = vadd.f32 %v4601_v27, %v1975_v4  ;;  %v2042_v22 = vmax.f32 %v1984_v12, 0.0 }
 0x226   : > { %v2040_v17 = vmax.f32 %v1976_v31, 0.0  ;;  %v2062_v25 = vpack.c.bf16 %v2042_v22, %v2041_v23 }
 0x228   : > { %v2061_v15 = vpack.c.bf16 %v2040_v17, %v2039_v33 }
 0x22a   : > { %2795 = vmatprep.mubr.bf16.mxu1 %v2061_v15 }
 0x22b   : > { %2796 = vmatmul.mubr.bf16.gmra.mxu1 %v2062_v25 }
 0x23d   : > { %v2753_v28 = vpop.f32.mrf.mxu0 }
 0x23e   : > { %v1997_v54 = vadd.f32 %v2753_v28, %v4601_v27 }
 0x23f   : > { %v1988_v29 = vpop.f32.mrf.mxu0 }
 0x240   : > { %v1989_v3 = vadd.f32 %v4601_v27, %v1988_v29  ;;  %v2045_v8 = vmax.f32 %v1997_v54, 0.0 }
 0x241   : > { %v2754_v30 = vpop.f32.mrf.mxu0 }
 0x242   : > { %v2000_v40 = vadd.f32 %v2754_v30, %v4601_v27  ;;  %v2043_v26 = vmax.f32 %v1989_v3, 0.0 }
 0x243   : > { %v1991_v61 = vpop.f32.mrf.mxu0 }
 0x244   : > { %v1992_v16 = vadd.f32 %v4601_v27, %v1991_v61  ;;  %v2046_v37 = vmax.f32 %v2000_v40, 0.0 }
 0x246   : > { %v2044_v50 = vmax.f32 %v1992_v16, 0.0  ;;  %v2064_v42 = vpack.c.bf16 %v2046_v37, %v2045_v8 }
 0x248   : > { %v2063_v41 = vpack.c.bf16 %v2044_v50, %v2043_v26 }
 0x24a   : > { %2799 = vmatprep.mubr.bf16.mxu1 %v2063_v41 }
 0x24b   : > { %2800 = vmatmul.mubr.bf16.gmra.mxu1 %v2064_v42  ;;  %v2777_v13 = vpop.f32.mrf.mxu1 }
 0x24c   : > { %v2181_v9 = vadd.f32 %v2777_v13, %v4686_v14 }
 0x24d   : > { %v2172_v51 = vpop.f32.mrf.mxu1 }
 0x24e   : > { %v2173_v1 = vadd.f32 %v4686_v14, %v2172_v51  ;;  %v2301_v12 = vmax.f32 %v2181_v9, 0.0 }
 0x24f   : > { %v2778_v21 = vpop.f32.mrf.mxu1 }
 0x250   : > { %v2299_v10 = vmax.f32 %v2173_v1, 0.0  ;;  %v2184_v43 = vadd.f32 %v2778_v21, %v4686_v14 }
 0x251   : > { %v2175_v39 = vpop.f32.mrf.mxu1 }
 0x252   : > { %v2176_v47 = vadd.f32 %v4686_v14, %v2175_v39  ;;  %v2302_v17 = vmax.f32 %v2184_v43, 0.0 }
 0x254   : > { %v2300_v59 = vmax.f32 %v2176_v47, 0.0 }
 0x256   : > { %v2332_v11 = vadd.f32 %v2300_v59, %v2299_v10 }
 0x258   : > { %v2333_v31 = vadd.f32 %v2332_v11, %v2301_v12 }
 0x25a   : > { %v2757_v32 = vpop.f32.mrf.mxu0  ;;  %v2334_v25 = vadd.f32 %v2333_v31, %v2302_v17 }
 0x25b   : > { %v2013_v19 = vadd.f32 %v2757_v32, %v4601_v27 }
 0x25c   : > { %v2004_v44 = vpop.f32.mrf.mxu0 }
 0x25d   : > { %v2005_v6 = vadd.f32 %v4601_v27, %v2004_v44  ;;  %v2049_v48 = vmax.f32 %v2013_v19, 0.0 }
 0x25e   : > { %v2758_v20 = vpop.f32.mrf.mxu0 }
 0x25f   : > { %v2016_v36 = vadd.f32 %v2758_v20, %v4601_v27  ;;  %v2047_v62 = vmax.f32 %v2005_v6, 0.0 }
 0x260   : > { %v2007_v45 = vpop.f32.mrf.mxu0 }
 0x261   : > { %v2008_v55 = vadd.f32 %v4601_v27, %v2007_v45  ;;  %v2050_v46 = vmax.f32 %v2016_v36, 0.0  ;;  %v3551_v27 = vld [vmem:[%s4779_s5 + $0x28] sm:$0xff]  }
 0x262   : > { %2812 = vmatpush3.bf16.msra.mxu0 %v3551_v27 }
 0x263   : > { %v2048_v2 = vmax.f32 %v2008_v55, 0.0  ;;  %v2066_v35 = vpack.c.bf16 %v2050_v46, %v2049_v48  ;;  %2813 = vmatprep.subr.bf16.mxu0 %v3635_v0 }
 0x265   : > { %v2065_v7 = vpack.c.bf16 %v2048_v2, %v2047_v62 }
 0x266   : > { %2814 = vmatpush3.bf16.msra.mxu0 %v3552_v52 }
 0x267   : > { %2803 = vmatprep.mubr.bf16.mxu1 %v2065_v7  ;;  %2815 = vmatprep.subr.bf16.mxu0 %v3635_v0 }
 0x268   : > { %2804 = vmatmul.mubr.bf16.gmra.mxu1 %v2066_v35 }
 0x26a   : > { %2816 = vmatpush3.bf16.msra.mxu0 %v3553_v56 }
 0x26b   : > { %2817 = vmatprep.subr.bf16.mxu0 %v3635_v0  ;;  %v2781_v18 = vpop.f32.mrf.mxu1 }
 0x26c   : > { %v2197_v29 = vadd.f32 %v2781_v18, %v4686_v14 }
 0x26d   : > { %v2188_v60 = vpop.f32.mrf.mxu1 }
 0x26e   : > { %2818 = vmatpush3.bf16.msra.mxu0 %v3554_v5  ;;  %v2189_v4 = vadd.f32 %v4686_v14, %v2188_v60  ;;  %v2305_v54 = vmax.f32 %v2197_v29, 0.0 }
 0x26f   : > { %2819 = vmatprep.subr.bf16.mxu0 %v3635_v0  ;;  %v2782_v53 = vpop.f32.mrf.mxu1 }
 0x270   : > { %v2303_v23 = vmax.f32 %v2189_v4, 0.0  ;;  %v2200_v61 = vadd.f32 %v2782_v53, %v4686_v14 }
 0x271   : > { %v2191_v63 = vpop.f32.mrf.mxu1 }
 0x272   : > { %2820 = vmatpush3.bf16.msra.mxu0 %v3555_v58  ;;  %v2192_v22 = vadd.f32 %v4686_v14, %v2191_v63  ;;  %v2335_v30 = vadd.f32 %v2334_v25, %v2303_v23  ;;  %v2306_v8 = vmax.f32 %v2200_v61, 0.0 }
 0x273   : > { %2821 = vmatprep.subr.bf16.mxu0 %v3635_v0 }
 0x274   : > { %v2304_v28 = vmax.f32 %v2192_v22, 0.0 }
 0x276   : > { %2822 = vmatpush3.bf16.msra.mxu0 %v3556_v24  ;;  %v2336_v40 = vadd.f32 %v2335_v30, %v2304_v28 }
 0x278   : > { %v2337_v26 = vadd.f32 %v2336_v40, %v2305_v54 }
 0x27a   : > { %v2338_v32 = vadd.f32 %v2337_v26, %v2306_v8 }
 0x28b   : > { %v2785_v38 = vpop.f32.mrf.mxu1 }
 0x28c   : > { %v2213_v6 = vadd.f32 %v2785_v38, %v4686_v14 }
 0x28d   : > { %v2204_v34 = vpop.f32.mrf.mxu1 }
 0x28e   : > { %v2205_v16 = vadd.f32 %v4686_v14, %v2204_v34  ;;  %v2309_v55 = vmax.f32 %v2213_v6, 0.0 }
 0x28f   : > { %v2786_v0 = vpop.f32.mrf.mxu1 }
 0x290   : > { %v2307_v41 = vmax.f32 %v2205_v16, 0.0  ;;  %v2216_v46 = vadd.f32 %v2786_v0, %v4686_v14 }
 0x291   : > { %v2207_v33 = vpop.f32.mrf.mxu1 }
 0x292   : > { %v2208_v50 = vadd.f32 %v4686_v14, %v2207_v33  ;;  %v2339_v36 = vadd.f32 %v2338_v32, %v2307_v41  ;;  %v2310_v35 = vmax.f32 %v2216_v46, 0.0 }
 0x294   : > { %v2308_v44 = vmax.f32 %v2208_v50, 0.0 }
 0x296   : > { %v2340_v19 = vadd.f32 %v2339_v36, %v2308_v44 }
 0x298   : > { %v2341_v2 = vadd.f32 %v2340_v19, %v2309_v55 }
 0x29a   : > { %v2342_v57 = vadd.f32 %v2341_v2, %v2310_v35 }
 0x2ab   : > { %v2789_v15 = vpop.f32.mrf.mxu1 }
 0x2ac   : > { %v2229_v51 = vadd.f32 %v2789_v15, %v4686_v14 }
 0x2ad   : > { %v2220_v3 = vpop.f32.mrf.mxu1 }
 0x2ae   : > { %v2221_v62 = vadd.f32 %v4686_v14, %v2220_v3  ;;  %v2313_v39 = vmax.f32 %v2229_v51, 0.0 }
 0x2af   : > { %v2790_v37 = vpop.f32.mrf.mxu1 }
 0x2b0   : > { %v2311_v49 = vmax.f32 %v2221_v62, 0.0  ;;  %v2232_v5 = vadd.f32 %v2790_v37, %v4686_v14 }
 0x2b1   : > { %v2223_v42 = vpop.f32.mrf.mxu1 }
 0x2b2   : > { %v2224_v48 = vadd.f32 %v4686_v14, %v2223_v42  ;;  %v2343_v52 = vadd.f32 %v2342_v57, %v2311_v49  ;;  %v2314_v53 = vmax.f32 %v2232_v5, 0.0 }
 0x2b4   : > { %v2312_v27 = vmax.f32 %v2224_v48, 0.0 }
 0x2b6   : > { %v2344_v56 = vadd.f32 %v2343_v52, %v2312_v27 }
 0x2b8   : > { %v2345_v60 = vadd.f32 %v2344_v56, %v2313_v39 }
 0x2ba   : > { %v2346_v38 = vadd.f32 %v2345_v60, %v2314_v53  ;;  %v2331_v53 = vld [vmem:[#allocation3] sm:$0x1] }
 0x2cb   : > { %v2793_v20 = vpop.f32.mrf.mxu1 }
 0x2cc   : > { %v2245_v59 = vadd.f32 %v2793_v20, %v4686_v14 }
 0x2cd   : > { %v2236_v45 = vpop.f32.mrf.mxu1 }
 0x2ce   : > { %v2237_v18 = vadd.f32 %v4686_v14, %v2236_v45  ;;  %v2317_v0 = vmax.f32 %v2245_v59, 0.0 }
 0x2cf   : > { %v2794_v7 = vpop.f32.mrf.mxu1 }
 0x2d0   : > { %v2315_v63 = vmax.f32 %v2237_v18, 0.0  ;;  %v2248_v12 = vadd.f32 %v2794_v7, %v4686_v14 }
 0x2d1   : > { %v2239_v13 = vpop.f32.mrf.mxu1 }
 0x2d2   : > { %v2240_v24 = vadd.f32 %v4686_v14, %v2239_v13  ;;  %v2347_v34 = vadd.f32 %v2346_v38, %v2315_v63  ;;  %v2318_v33 = vmax.f32 %v2248_v12, 0.0  ;;  %v2380_v38 = vlaneseq }
 0x2d4   : > { %v2316_v1 = vmax.f32 %v2240_v24, 0.0 }
 0x2d6   : > { %v2348_v10 = vadd.f32 %v2347_v34, %v2316_v1  ;;  %v2381_v1 = vshrl.u32 %v2380_v38, 7 }
 0x2d8   : > { %v2349_v4 = vadd.f32 %v2348_v10, %v2317_v0  ;;  %v2598_v0 = vld [vmem:[%s4780_s6] ss:$0 sm:$0xff] }
 0x2da   : > { %v2350_v23 = vadd.f32 %v2349_v4, %v2318_v33 }
 0x2eb   : > { %v2797_v21 = vpop.f32.mrf.mxu1 }
 0x2ec   : > { %v2261_v28 = vadd.f32 %v2797_v21, %v4686_v14 }
 0x2ed   : > { %v2252_v58 = vpop.f32.mrf.mxu1 }
 0x2ee   : > { %v2253_v43 = vadd.f32 %v4686_v14, %v2252_v58  ;;  %v2321_v40 = vmax.f32 %v2261_v28, 0.0 }
 0x2ef   : > { %v2798_v47 = vpop.f32.mrf.mxu1 }
 0x2f0   : > { %v2319_v17 = vmax.f32 %v2253_v43, 0.0  ;;  %v2264_v54 = vadd.f32 %v2798_v47, %v4686_v14 }
 0x2f1   : > { %v2255_v9 = vpop.f32.mrf.mxu1 }
 0x2f2   : > { %v2256_v31 = vadd.f32 %v4686_v14, %v2255_v9  ;;  %v2351_v29 = vadd.f32 %v2350_v23, %v2319_v17  ;;  %v2322_v26 = vmax.f32 %v2264_v54, 0.0  ;;  %v2382_v9 = vsub.s32 0, %v2381_v1 }
 0x2f4   : > { %v2320_v15 = vmax.f32 %v2256_v31, 0.0 }
 0x2f6   : > { %v2352_v30 = vadd.f32 %v2351_v29, %v2320_v15 }
 0x2f8   : > { %v2353_v16 = vadd.f32 %v2352_v30, %v2321_v40 }
 0x2fa   : > { %v2354_v8 = vadd.f32 %v2353_v16, %v2322_v26 }
 0x30b   : > { %v2801_v11 = vpop.f32.mrf.mxu1 }
 0x30c   : > { %v2277_v42 = vadd.f32 %v2801_v11, %v4686_v14 }
 0x30d   : > { %v2268_v22 = vpop.f32.mrf.mxu1 }
 0x30e   : > { %v2269_v61 = vadd.f32 %v4686_v14, %v2268_v22  ;;  %v2325_v6 = vmax.f32 %v2277_v42, 0.0 }
 0x30f   : > { %v2802_v25 = vpop.f32.mrf.mxu1 }
 0x310   : > { %v2323_v50 = vmax.f32 %v2269_v61, 0.0  ;;  %v2280_v36 = vadd.f32 %v2802_v25, %v4686_v14 }
 0x311   : > { %v2271_v3 = vpop.f32.mrf.mxu1 }
 0x312   : > { %v2272_v37 = vadd.f32 %v4686_v14, %v2271_v3  ;;  %v2355_v32 = vadd.f32 %v2354_v8, %v2323_v50  ;;  %v2326_v62 = vmax.f32 %v2280_v36, 0.0 }
 0x314   : > { %v2324_v41 = vmax.f32 %v2272_v37, 0.0 }
 0x316   : > { %v2356_v44 = vadd.f32 %v2355_v32, %v2324_v41 }
 0x318   : > { %v2357_v45 = vadd.f32 %v2356_v44, %v2325_v6 }
 0x31a   : > { %v2358_v35 = vadd.f32 %v2357_v45, %v2326_v62 }
 0x328   : > { %v2805_v20 = vpop.f32.mrf.mxu1 }
 0x329   : > { %v2293_v7 = vadd.f32 %v2805_v20, %v4686_v14 }
 0x32a   : > { %v2284_v19 = vpop.f32.mrf.mxu1 }
 0x32b   : > { %v2285_v55 = vadd.f32 %v4686_v14, %v2284_v19  ;;  %v2329_v51 = vmax.f32 %v2293_v7, 0.0 }
 0x32c   : > { %v2806_v46 = vpop.f32.mrf.mxu1 }
 0x32d   : > { %v2327_v2 = vmax.f32 %v2285_v55, 0.0  ;;  %v2296_v27 = vadd.f32 %v2806_v46, %v4686_v14 }
 0x32e   : > { %v2287_v48 = vpop.f32.mrf.mxu1 }
 0x32f   : > { %v2288_v49 = vadd.f32 %v4686_v14, %v2287_v48  ;;  %v2359_v57 = vadd.f32 %v2358_v35, %v2327_v2  ;;  %v2330_v21 = vmax.f32 %v2296_v27, 0.0 }
 0x331   : > { %v2328_v13 = vmax.f32 %v2288_v49, 0.0 }
 0x333   : > { %v2360_v52 = vadd.f32 %v2359_v57, %v2328_v13 }
 0x335   : > { %v2361_v56 = vadd.f32 %v2360_v52, %v2329_v51 }
 0x337   : > { %v2362_v39 = vadd.f32 %v2361_v56, %v2330_v21 }
 0x339   : > { %v2363_v5 = vrot.slane %v2362_v39, 4 }
 0x33b   : > { %v2364_v18 = vadd.f32 %v2363_v5, %v2362_v39 }
 0x33d   : > { %v2365_v58 = vrot.slane %v2364_v18, 2 }
 0x33f   : > { %v2366_v60 = vadd.f32 %v2365_v58, %v2364_v18 }
 0x341   : > { %v2367_v24 = vrot.slane %v2366_v60, 1 }
 0x343   : > { %v2368_v63 = vadd.f32 %v2367_v24, %v2366_v60 }
 0x345   : > { %v2369_v47 = vadd.f32 %v2368_v63, %v2331_v53 }
 0x347   : > { %2370 = vst [vmem:[#allocation3] sm:$0x1] %v2369_v47 }
 0x34e   : > { %v2374_v14 = vld [vmem:[#allocation3] sm:$0x1] }
 0x34f   : > { %v2375_v59 = vmul.f32 0.00390625, %v2374_v14 }
 0x351   : > { %v2376_v34 = vpack.c.bf16 %v2375_v59, %v2375_v59 }
 0x353   : > { %v2378_v10 = vpack.i.b16 %v2376_v34, %v2376_v34 }
 0x355   : > { %v2383_v11 = vrot.slane %v2378_v10, %v2382_v9 }
 0x357   : > { %2824 = vmatmul.mubr.bf16.vlgmr.msra.gmra.mxu0 %v2383_v11 }
 0x417   : > { %v2489_v12 = vpop.f32.mrf.mxu0 }
 0x418   : > { %v2490_v43 = vadd.f32 %v2598_v0, %v2489_v12 }
 0x419   : > { %v2825_v4 = vpop.f32.mrf.mxu0 }
 0x41a   : > { %2495 = vst [vmem:[%s282_s8] sm:$0x1] %v2490_v43 }
 0x41b   : > { %v2492_v31 = vpop.f32.mrf.mxu0 }
 0x41c   : > { %3570 = shalt.err (!%p3567_p5)
}
 0x41d   : > { %s3571_s30 = scalar_lea.hbm %s4728_s18, 16  ;;  %s3575_s17 = scalar_lea.hbm %s4781_s7, 32 }
 0x41e   : > { %p3572_p6 = scmp.ne.s32.totalorder %s4728_s18, %s3571_s30  ;;  %p3576_p10 = scmp.lt.s32.totalorder %s4728_s18, %s4781_s7 }
 0x41f   : > { %p3577_p11 = scmp.lt.s32.totalorder %s3575_s17, %s3571_s30 }
 0x420   : > { %p3573_p7 = pnand %p3572_p6, %p3726_p4 }
 0x421   : > { %p3578_p12 = por %p3577_p11, %p3576_p10 }
 0x422   : > { %p3574_p9 = pneg %p3573_p7 }
 0x424   : > { %p3579_p13 = pnand %p3578_p12, %p3574_p9 }
 0x426   : > { %3582 = shalt.err (!%p3579_p13)
}
 0x427   : > { %2828 = dma.vmem_to_hbm [thread:$0]  (%p3726_p4), %s4730_s10, 16, %s4728_s18, %s2497_s23   ;;  %v2826_v22 = vpop.f32.mrf.mxu0 }
 0x428 PF: > { %p2834_p0 = scmp.ge.s32.totalorder %s3633_s29, 2  ;;  %s2521_s20 = sand.u32 1, %s3613_s24  }
 0x429   : > { %s2522_s15 = scalar_lea.sflag [#allocation5], %s2521_s20 }
 0x42a   : > { %p2831_p1 = pnand %p2834_p0, %p3733_p8 }
 0x42c   : > { %p2832_p2 = pneg %p2831_p1 }
 0x42e   : > { %3608 = dma.done.wait (%p2832_p2), %s2522_s15, 16  }
 0x42f   : > { %3610 = vsyncadd (%p2832_p2), %s2522_s15, 4294967280  ;;  %s20_s29 = sadd.s32 1, %s3633_s29   ;;  %s4784_s24 = smov %s3617_s25 }
 0x430   : > { %p17_p3 = scmp.ge.s32.totalorder %s20_s29, 4   ;;  %s4785_s25 = smov %s3621_s26 }
 0x431   : > { %s4786_s26 = smov %s3739_s14  ;;  %s4787_s27 = smov %s3629_s28 }
 0x432   : > { %s4788_s28 = smov %s4790_s9  ;;  %19 = sbr.rel (!%p17_p3) target bundleno = 4 (0x4), region = 92 }
 0x437   :  { %2526 = vsyncpa [#allocation5], 1 }
 0x438   :  { %2528 = vsyncpa [#allocation5 + $0x1], 1 }

</bundles_post_ra>
